<compile_context>
chip_gen: v6e
topology: v6e:2x2x1
jax: 0.10.0
libtpu: 0.0.40
codegen_flags: <defaults>
</compile_context>

<pallas_src>
import functools
import math

import jax
import jax.numpy as jnp
from jax.experimental import pallas as pl
from jax.experimental.pallas import tpu as pltpu


def _round_up(x, m):
    return (x + m - 1) // m * m


def _pad_axis(a, target, axis):
    if a.shape[axis] == target:
        return a
    widths = [(0, 0)] * a.ndim
    widths[axis] = (0, target - a.shape[axis])
    return jnp.pad(a, widths)


# ----------------------------------------------------------------------------
# Fused kernel: grid = (batch_blocks,).  All layers run inside the kernel on a
# resident activation; weights (stacked over L) are VMEM-resident.
# ----------------------------------------------------------------------------
def _fnet_encoder_kernel(eps, h_real, num_layers, bb, S, P,
                         x_ref,                        # (bb, S, P)
                         dhr_ref, dhi_ref,             # (P, P) hidden DFT re / im
                         dsr_ref, dsi_ref,             # (S, S) seq DFT re / im
                         g1_ref, be1_ref,              # (L, 1, P)  mixing LayerNorm
                         w1_ref, b1_ref,               # (L, P, Ip), (L, 1, Ip)
                         w2_ref, b2_ref,               # (L, Ip, P), (L, 1, P)
                         g2_ref, be2_ref,              # (L, 1, P)  output LayerNorm
                         o_ref):                       # (bb, S, P)
    m = bb * S
    inv_h = 1.0 / float(h_real)
    inv_sqrt2 = 1.0 / math.sqrt(2.0)

    dhr = dhr_ref[...]
    dhi = dhi_ref[...]

    # Hoist seq-DFT operands (and any broadcast) out of the layer loop:
    # JAX does not CSE broadcast_in_dim, so do it once per batch block.
    if bb == 1:
        dsr2 = dsr_ref[...]                            # (S, S)
        dsi2 = dsi_ref[...]
    else:
        dsr_b = jnp.broadcast_to(dsr_ref[...], (bb, S, S))
        dsi_b = jnp.broadcast_to(dsi_ref[...], (bb, S, S))

    def layer_norm(v, g, b):
        # Padded lanes of v are exactly zero, so sums / h_real give exact
        # statistics over the real hidden width; zero-padded gamma/beta keep
        # padded lanes at exactly zero on output.
        mu = jnp.sum(v, axis=-1, keepdims=True) * inv_h
        ms = jnp.sum(v * v, axis=-1, keepdims=True) * inv_h
        var = jnp.maximum(ms - mu * mu, 0.0)           # clamp: avoid rsqrt(neg) NaN
        return (v - mu) * jax.lax.rsqrt(var + eps) * g + b

    def one_layer(l, x):                               # x: (M, P) f32
        # ---- Fourier mixing: Re(F_seq @ X @ F_hid), X real -----------------
        t_re = jnp.dot(x, dhr, preferred_element_type=jnp.float32)     # (M, P)
        t_im = jnp.dot(x, dhi, preferred_element_type=jnp.float32)     # (M, P)
        if bb == 1:
            mix = (jnp.dot(dsr2, t_re, preferred_element_type=jnp.float32)
                   - jnp.dot(dsi2, t_im, preferred_element_type=jnp.float32))
        else:
            # (M,P) <-> (bb,S,P) reshapes are layout-preserving (S%8==0, P%128==0).
            mix = (jnp.einsum('bst,bth->bsh', dsr_b, t_re.reshape(bb, S, P),
                              preferred_element_type=jnp.float32)
                   - jnp.einsum('bst,bth->bsh', dsi_b, t_im.reshape(bb, S, P),
                                preferred_element_type=jnp.float32)
                   ).reshape(m, P)

        # fft_output = mixing_layer_norm(fft_output + hidden_states)
        h1 = layer_norm(mix + x, g1_ref[l], be1_ref[l])

        # feed_forward -> exact (erf) GELU, matching nn.GELU() default
        inter = jnp.dot(h1, w1_ref[l], preferred_element_type=jnp.float32) + b1_ref[l]
        inter = 0.5 * inter * (1.0 + jax.lax.erf(inter * inv_sqrt2))

        # output_dense; dropout is identity (eval mode)
        out = jnp.dot(inter, w2_ref[l], preferred_element_type=jnp.float32) + b2_ref[l]

        # output_layer_norm(output + fft_output)   [fft_output == post-LN h1]
        return layer_norm(out + h1, g2_ref[l], be2_ref[l])

    x0 = x_ref[...].reshape(m, P)
    y = jax.lax.fori_loop(0, num_layers, one_layer, x0, unroll=True)
    o_ref[...] = y.reshape(bb, S, P).astype(o_ref.dtype)


def fnet_encoder(x, layer_params, dft_mats, eps, *, batch_block=None):
    """All FNet layers applied to x of shape (B, S, H) in one pallas_call."""
    B, S, H = x.shape
    L = len(layer_params)
    I = layer_params[0]["w1"].shape[1]
    P = _round_up(H, 128)
    Ip = _round_up(I, 128)
    assert S % 8 == 0, "sequence length must be a multiple of 8 (sublane tiling)"

    if batch_block is None:
        # Prefer >= 2 batch blocks (v7x megacore), cap M = bb*S at 256 rows.
        divs = [d for d in range(1, B + 1) if B % d == 0]
        pref = [d for d in divs if B // d >= 2 and d * S <= 256]
        if pref:
            bb = max(pref)
        else:
            fits = [d for d in divs if d * S <= 256]
            bb = max(fits) if fits else 1
    else:
        bb = batch_block
    assert B % bb == 0, "batch_block must divide batch"
    nb = B // bb

    dsr, dsi, dhr, dhi = dft_mats
    # Zero-padded DFT / weight operands (padded lanes stay exactly zero
    # end-to-end).  At real FNet sizes, cast these to bf16 AFTER padding and
    # set vmem_limit_bytes; kept f32 here for exact f32 reference comparison.
    dhr_p = _pad_axis(_pad_axis(dhr, P, 0), P, 1)                    # (P, P)
    dhi_p = _pad_axis(_pad_axis(dhi, P, 0), P, 1)                    # (P, P)

    def stack(name, rows, cols):
        return jnp.stack([_pad_axis(_pad_axis(p[name], rows, -2), cols, -1)
                          for p in layer_params], axis=0)

    g1s = stack("ln1_g", 1, P); be1s = stack("ln1_b", 1, P)
    w1s = stack("w1", P, Ip);   b1s = stack("b1", 1, Ip)
    w2s = stack("w2", Ip, P);   b2s = stack("b2", 1, P)
    g2s = stack("ln2_g", 1, P); be2s = stack("ln2_b", 1, P)

    x_p = _pad_axis(x, P, -1)

    const2 = lambda r, c: pl.BlockSpec((r, c), lambda ib: (0, 0))
    const3 = lambda a, r, c: pl.BlockSpec((a, r, c), lambda ib: (0, 0, 0))

    flops = L * B * S * 4 * P * (P + S + Ip)
    bytes_accessed = 4 * (2 * x_p.size
                          + nb * (dhr_p.size + dhi_p.size + dsr.size + dsi.size
                                  + g1s.size + be1s.size + w1s.size + b1s.size
                                  + w2s.size + b2s.size + g2s.size + be2s.size))
    cost = pl.CostEstimate(flops=flops, transcendentals=L * B * S * Ip,
                           bytes_accessed=bytes_accessed)

    kernel = functools.partial(_fnet_encoder_kernel, eps, H, L, bb, S, P)
    out_p = pl.pallas_call(
        kernel,
        out_shape=jax.ShapeDtypeStruct((B, S, P), jnp.float32),
        grid_spec=pltpu.PrefetchScalarGridSpec(
            num_scalar_prefetch=0,
            grid=(nb,),
            in_specs=[
                pl.BlockSpec((bb, S, P), lambda ib: (ib, 0, 0)),     # x
                const2(P, P), const2(P, P),                          # hidden DFT re / im
                const2(S, S), const2(S, S),                          # seq DFT re / im
                const3(L, 1, P), const3(L, 1, P),                    # LN1 gamma / beta
                const3(L, P, Ip), const3(L, 1, Ip),                  # feed_forward W, b
                const3(L, Ip, P), const3(L, 1, P),                   # output_dense W, b
                const3(L, 1, P), const3(L, 1, P),                    # LN2 gamma / beta
            ],
            out_specs=pl.BlockSpec((bb, S, P), lambda ib: (ib, 0, 0)),
        ),
        compiler_params=pltpu.CompilerParams(
            dimension_semantics=("parallel",)),
        # NOTE: at real FNet sizes (P=768, Ip=3072) also set vmem_limit_bytes
        # and add an Ip-tiling axis for the FFN matmuls to fit v7x's 64 MiB.
        cost_estimate=cost,
    )(x_p, dhr_p, dhi_p, dsr, dsi, g1s, be1s, w1s, b1s, w2s, b2s, g2s, be2s)

    return out_p[:, :, :H]


# ----------------------------------------------------------------------------
# Deterministic parameter construction (matches module __init__ shapes).
# ----------------------------------------------------------------------------
def make_dft_matrices(S, H):
    """scipy.linalg.dft(n)[j,k] = exp(-2*pi*i*j*k/n) -> cos - i*sin."""
    def dft(n):
        idx = jnp.arange(n, dtype=jnp.float32)
        theta = 2.0 * math.pi * jnp.outer(idx, idx) / n
        return jnp.cos(theta), -jnp.sin(theta)
    dsr, dsi = dft(S)
    dhr, dhi = dft(H)
    return dsr, dsi, dhr, dhi


def make_layer_params(key, H, I):
    ks = jax.random.split(key, 4)
    # nn.Linear stores weight as (out, in); we keep it pre-transposed (in, out).
    w1 = jax.random.uniform(ks[0], (H, I), jnp.float32, -1.0 / math.sqrt(H), 1.0 / math.sqrt(H))
    b1 = jax.random.uniform(ks[1], (1, I), jnp.float32, -1.0 / math.sqrt(H), 1.0 / math.sqrt(H))
    w2 = jax.random.uniform(ks[2], (I, H), jnp.float32, -1.0 / math.sqrt(I), 1.0 / math.sqrt(I))
    b2 = jax.random.uniform(ks[3], (1, H), jnp.float32, -1.0 / math.sqrt(I), 1.0 / math.sqrt(I))
    return {
        "ln1_g": jnp.ones((1, H), jnp.float32), "ln1_b": jnp.zeros((1, H), jnp.float32),
        "w1": w1, "b1": b1, "w2": w2, "b2": b2,
        "ln2_g": jnp.ones((1, H), jnp.float32), "ln2_b": jnp.zeros((1, H), jnp.float32),
    }


# ----------------------------------------------------------------------------
# Pure-JAX reference (same math, no Pallas) for a sanity check.
# ----------------------------------------------------------------------------
def _ref_layer(x, dft_mats, p, eps):
    dsr, dsi, dhr, dhi = dft_mats
    mix = jnp.einsum("sn,bnh->bsh", dsr, jnp.einsum("bsh,hk->bsk", x, dhr)) \
        - jnp.einsum("sn,bnh->bsh", dsi, jnp.einsum("bsh,hk->bsk", x, dhi))
    def ln(v, g, b):
        mu = v.mean(-1, keepdims=True)
        var = ((v - mu) ** 2).mean(-1, keepdims=True)
        return (v - mu) * jax.lax.rsqrt(var + eps) * g + b
    h1 = ln(mix + x, p["ln1_g"], p["ln1_b"])
    inter = jax.nn.gelu(h1 @ p["w1"] + p["b1"], approximate=False)
    out = inter @ p["w2"] + p["b2"]
    return ln(out + h1, p["ln2_g"], p["ln2_b"])


if __name__ == "__main__":
    # config: num_hidden_layers=2, max_position_embeddings=8, hidden_size=32,
    #         intermediate_size=64, layer_norm_eps=1e-12, fourier='matmul',
    #         dropout_rate=0.0 (eval mode -> identity)
    B, S, H, I = 2, 8, 32, 64
    NUM_LAYERS = 2
    EPS = 1e-12

    key = jax.random.PRNGKey(0)
    k_x, k_p = jax.random.split(key)
    x = jax.random.normal(k_x, (B, S, H), jnp.float32)

    dft_mats = make_dft_matrices(S, H)
    layer_keys = jax.random.split(k_p, NUM_LAYERS)
    layer_params = [make_layer_params(k, H, I) for k in layer_keys]

    # pure-JAX reference
    ref = x
    for p in layer_params:
        ref = _ref_layer(ref, dft_mats, p, EPS)
    ref = jax.block_until_ready(ref)

    # default path: bb=1, nb=2 (both TensorCores busy on v7x; plain 2-D seq mix)
    out = fnet_encoder(x, layer_params, dft_mats, EPS)
    out = jax.block_until_ready(out)
    assert out.shape == (B, S, H)
    assert jnp.allclose(out, ref, atol=2e-4, rtol=2e-4), float(jnp.max(jnp.abs(out - ref)))

    # bigger batch block: bb=2, nb=1 (exercises the batched-einsum seq-mix path)
    out2 = fnet_encoder(x, layer_params, dft_mats, EPS, batch_block=2)
    out2 = jax.block_until_ready(out2)
    assert jnp.allclose(out2, ref, atol=2e-4, rtol=2e-4), float(jnp.max(jnp.abs(out2 - ref)))

    print("KERNEL_OK")
</pallas_src>

<mosaic_0001>
module attributes {stable_mosaic.version = 11 : i64} {
  func.func @_fnet_encoder_kernel(%arg0: i32, %arg1: memref<1x8x128xf32, #tpu.memory_space<vmem>>, %arg2: memref<128x128xf32, #tpu.memory_space<vmem>>, %arg3: memref<128x128xf32, #tpu.memory_space<vmem>>, %arg4: memref<8x8xf32, #tpu.memory_space<vmem>>, %arg5: memref<8x8xf32, #tpu.memory_space<vmem>>, %arg6: memref<2x1x128xf32, #tpu.memory_space<vmem>>, %arg7: memref<2x1x128xf32, #tpu.memory_space<vmem>>, %arg8: memref<2x128x128xf32, #tpu.memory_space<vmem>>, %arg9: memref<2x1x128xf32, #tpu.memory_space<vmem>>, %arg10: memref<2x128x128xf32, #tpu.memory_space<vmem>>, %arg11: memref<2x1x128xf32, #tpu.memory_space<vmem>>, %arg12: memref<2x1x128xf32, #tpu.memory_space<vmem>>, %arg13: memref<2x1x128xf32, #tpu.memory_space<vmem>>, %arg14: memref<1x8x128xf32, #tpu.memory_space<vmem>>) attributes {dimension_semantics = [#tpu.dimension_semantics<parallel>], iteration_bounds = array<i64: 2>, scalar_prefetch = 0 : i64, scratch_operands = 0 : i64, tpu.core_type = #tpu.core_type<tc>, window_params = [{transform_indices = @transform_0, window_bounds = array<i64: 1, 8, 128>}, {pipeline_mode = #tpu.pipeline_mode<synchronous>, transform_indices = @transform_1, window_bounds = array<i64: 128, 128>}, {pipeline_mode = #tpu.pipeline_mode<synchronous>, transform_indices = @transform_2, window_bounds = array<i64: 128, 128>}, {pipeline_mode = #tpu.pipeline_mode<synchronous>, transform_indices = @transform_3, window_bounds = array<i64: 8, 8>}, {pipeline_mode = #tpu.pipeline_mode<synchronous>, transform_indices = @transform_4, window_bounds = array<i64: 8, 8>}, {pipeline_mode = #tpu.pipeline_mode<synchronous>, transform_indices = @transform_5, window_bounds = array<i64: 2, 1, 128>}, {pipeline_mode = #tpu.pipeline_mode<synchronous>, transform_indices = @transform_6, window_bounds = array<i64: 2, 1, 128>}, {pipeline_mode = #tpu.pipeline_mode<synchronous>, transform_indices = @transform_7, window_bounds = array<i64: 2, 128, 128>}, {pipeline_mode = #tpu.pipeline_mode<synchronous>, transform_indices = @transform_8, window_bounds = array<i64: 2, 1, 128>}, {pipeline_mode = #tpu.pipeline_mode<synchronous>, transform_indices = @transform_9, window_bounds = array<i64: 2, 128, 128>}, {pipeline_mode = #tpu.pipeline_mode<synchronous>, transform_indices = @transform_10, window_bounds = array<i64: 2, 1, 128>}, {pipeline_mode = #tpu.pipeline_mode<synchronous>, transform_indices = @transform_11, window_bounds = array<i64: 2, 1, 128>}, {pipeline_mode = #tpu.pipeline_mode<synchronous>, transform_indices = @transform_12, window_bounds = array<i64: 2, 1, 128>}, {transform_indices = @transform_13, window_bounds = array<i64: 1, 8, 128>}]} {
    %c0 = arith.constant 0 : index
    %c0_0 = arith.constant 0 : index
    %0 = vector.load %arg2[%c0, %c0_0] : memref<128x128xf32, #tpu.memory_space<vmem>>, vector<128x128xf32>
    %c0_1 = arith.constant 0 : index
    %c0_2 = arith.constant 0 : index
    %1 = vector.load %arg3[%c0_1, %c0_2] : memref<128x128xf32, #tpu.memory_space<vmem>>, vector<128x128xf32>
    %c0_3 = arith.constant 0 : index
    %c0_4 = arith.constant 0 : index
    %2 = vector.load %arg4[%c0_3, %c0_4] : memref<8x8xf32, #tpu.memory_space<vmem>>, vector<8x8xf32>
    %c0_5 = arith.constant 0 : index
    %c0_6 = arith.constant 0 : index
    %3 = vector.load %arg5[%c0_5, %c0_6] : memref<8x8xf32, #tpu.memory_space<vmem>>, vector<8x8xf32>
    %c0_7 = arith.constant 0 : index
    %c0_8 = arith.constant 0 : index
    %c0_9 = arith.constant 0 : index
    %4 = vector.load %arg1[%c0_7, %c0_8, %c0_9] : memref<1x8x128xf32, #tpu.memory_space<vmem>>, vector<1x8x128xf32>
    %5 = vector.shape_cast %4 : vector<1x8x128xf32> to vector<8x128xf32>
    %c0_i32 = arith.constant 0 : i32
    %cst = arith.constant dense<0.000000e+00> : vector<8x128xf32>
    %6 = tpu.matmul %5, %0, %cst {dimension_numbers = #tpu.dot_dimension_numbers<[1], [0], [0], [1], [0, 0, 1, 1], [], []>} : vector<8x128xf32>, vector<128x128xf32>, vector<8x128xf32> -> vector<8x128xf32>
    %cst_10 = arith.constant dense<0.000000e+00> : vector<8x128xf32>
    %7 = tpu.matmul %5, %1, %cst_10 {dimension_numbers = #tpu.dot_dimension_numbers<[1], [0], [0], [1], [0, 0, 1, 1], [], []>} : vector<8x128xf32>, vector<128x128xf32>, vector<8x128xf32> -> vector<8x128xf32>
    %cst_11 = arith.constant dense<0.000000e+00> : vector<8x128xf32>
    %8 = tpu.matmul %2, %6, %cst_11 {dimension_numbers = #tpu.dot_dimension_numbers<[1], [0], [0], [1], [0, 0, 1, 1], [], []>} : vector<8x8xf32>, vector<8x128xf32>, vector<8x128xf32> -> vector<8x128xf32>
    %cst_12 = arith.constant dense<0.000000e+00> : vector<8x128xf32>
    %9 = tpu.matmul %3, %7, %cst_12 {dimension_numbers = #tpu.dot_dimension_numbers<[1], [0], [0], [1], [0, 0, 1, 1], [], []>} : vector<8x8xf32>, vector<8x128xf32>, vector<8x128xf32> -> vector<8x128xf32>
    %10 = arith.subf %8, %9 : vector<8x128xf32>
    %11 = arith.addf %10, %5 : vector<8x128xf32>
    %12 = arith.index_cast %c0_i32 : i32 to index
    %c0_13 = arith.constant 0 : index
    %c0_14 = arith.constant 0 : index
    %13 = vector.load %arg6[%12, %c0_13, %c0_14] : memref<2x1x128xf32, #tpu.memory_space<vmem>>, vector<1x1x128xf32>
    %14 = vector.shape_cast %13 : vector<1x1x128xf32> to vector<1x128xf32>
    %15 = arith.index_cast %c0_i32 : i32 to index
    %c0_15 = arith.constant 0 : index
    %c0_16 = arith.constant 0 : index
    %16 = vector.load %arg7[%15, %c0_15, %c0_16] : memref<2x1x128xf32, #tpu.memory_space<vmem>>, vector<1x1x128xf32>
    %17 = vector.shape_cast %16 : vector<1x1x128xf32> to vector<1x128xf32>
    %cst_17 = arith.constant dense<0.000000e+00> : vector<8xf32>
    %18 = vector.multi_reduction <add>, %11, %cst_17 [1] : vector<8x128xf32> to vector<8xf32>
    %19 = vector.shape_cast %18 : vector<8xf32> to vector<8x1xf32>
    %cst_18 = arith.constant 3.125000e-02 : f32
    %20 = vector.broadcast %cst_18 : f32 to vector<8x1xf32>
    %21 = arith.mulf %19, %20 : vector<8x1xf32>
    %22 = arith.mulf %11, %11 : vector<8x128xf32>
    %cst_19 = arith.constant dense<0.000000e+00> : vector<8xf32>
    %23 = vector.multi_reduction <add>, %22, %cst_19 [1] : vector<8x128xf32> to vector<8xf32>
    %24 = vector.shape_cast %23 : vector<8xf32> to vector<8x1xf32>
    %cst_20 = arith.constant 3.125000e-02 : f32
    %25 = vector.broadcast %cst_20 : f32 to vector<8x1xf32>
    %26 = arith.mulf %24, %25 : vector<8x1xf32>
    %27 = arith.mulf %21, %21 : vector<8x1xf32>
    %28 = arith.subf %26, %27 : vector<8x1xf32>
    %cst_21 = arith.constant 0.000000e+00 : f32
    %29 = vector.broadcast %cst_21 : f32 to vector<8x1xf32>
    %30 = arith.maximumf %28, %29 : vector<8x1xf32>
    %31 = vector.broadcast %21 : vector<8x1xf32> to vector<8x128xf32>
    %32 = arith.subf %11, %31 : vector<8x128xf32>
    %cst_22 = arith.constant 9.99999996E-13 : f32
    %33 = vector.broadcast %cst_22 : f32 to vector<8x1xf32>
    %34 = arith.addf %30, %33 : vector<8x1xf32>
    %35 = math.rsqrt %34 : vector<8x1xf32>
    %36 = vector.broadcast %35 : vector<8x1xf32> to vector<8x128xf32>
    %37 = arith.mulf %32, %36 : vector<8x128xf32>
    %38 = vector.broadcast %14 : vector<1x128xf32> to vector<8x128xf32>
    %39 = arith.mulf %37, %38 : vector<8x128xf32>
    %40 = vector.broadcast %17 : vector<1x128xf32> to vector<8x128xf32>
    %41 = arith.addf %39, %40 : vector<8x128xf32>
    %42 = arith.index_cast %c0_i32 : i32 to index
    %c0_23 = arith.constant 0 : index
    %c0_24 = arith.constant 0 : index
    %43 = vector.load %arg8[%42, %c0_23, %c0_24] : memref<2x128x128xf32, #tpu.memory_space<vmem>>, vector<1x128x128xf32>
    %44 = vector.shape_cast %43 : vector<1x128x128xf32> to vector<128x128xf32>
    %cst_25 = arith.constant dense<0.000000e+00> : vector<8x128xf32>
    %45 = tpu.matmul %41, %44, %cst_25 {dimension_numbers = #tpu.dot_dimension_numbers<[1], [0], [0], [1], [0, 0, 1, 1], [], []>} : vector<8x128xf32>, vector<128x128xf32>, vector<8x128xf32> -> vector<8x128xf32>
    %46 = arith.index_cast %c0_i32 : i32 to index
    %c0_26 = arith.constant 0 : index
    %c0_27 = arith.constant 0 : index
    %47 = vector.load %arg9[%46, %c0_26, %c0_27] : memref<2x1x128xf32, #tpu.memory_space<vmem>>, vector<1x1x128xf32>
    %48 = vector.shape_cast %47 : vector<1x1x128xf32> to vector<1x128xf32>
    %49 = vector.broadcast %48 : vector<1x128xf32> to vector<8x128xf32>
    %50 = arith.addf %45, %49 : vector<8x128xf32>
    %cst_28 = arith.constant 5.000000e-01 : f32
    %51 = vector.broadcast %cst_28 : f32 to vector<8x128xf32>
    %52 = arith.mulf %51, %50 : vector<8x128xf32>
    %cst_29 = arith.constant 0.707106769 : f32
    %53 = vector.broadcast %cst_29 : f32 to vector<8x128xf32>
    %54 = arith.mulf %50, %53 : vector<8x128xf32>
    %55 = math.erf %54 : vector<8x128xf32>
    %cst_30 = arith.constant 1.000000e+00 : f32
    %56 = vector.broadcast %cst_30 : f32 to vector<8x128xf32>
    %57 = arith.addf %56, %55 : vector<8x128xf32>
    %58 = arith.mulf %52, %57 : vector<8x128xf32>
    %59 = arith.index_cast %c0_i32 : i32 to index
    %c0_31 = arith.constant 0 : index
    %c0_32 = arith.constant 0 : index
    %60 = vector.load %arg10[%59, %c0_31, %c0_32] : memref<2x128x128xf32, #tpu.memory_space<vmem>>, vector<1x128x128xf32>
    %61 = vector.shape_cast %60 : vector<1x128x128xf32> to vector<128x128xf32>
    %cst_33 = arith.constant dense<0.000000e+00> : vector<8x128xf32>
    %62 = tpu.matmul %58, %61, %cst_33 {dimension_numbers = #tpu.dot_dimension_numbers<[1], [0], [0], [1], [0, 0, 1, 1], [], []>} : vector<8x128xf32>, vector<128x128xf32>, vector<8x128xf32> -> vector<8x128xf32>
    %63 = arith.index_cast %c0_i32 : i32 to index
    %c0_34 = arith.constant 0 : index
    %c0_35 = arith.constant 0 : index
    %64 = vector.load %arg11[%63, %c0_34, %c0_35] : memref<2x1x128xf32, #tpu.memory_space<vmem>>, vector<1x1x128xf32>
    %65 = vector.shape_cast %64 : vector<1x1x128xf32> to vector<1x128xf32>
    %66 = vector.broadcast %65 : vector<1x128xf32> to vector<8x128xf32>
    %67 = arith.addf %62, %66 : vector<8x128xf32>
    %68 = arith.addf %67, %41 : vector<8x128xf32>
    %69 = arith.index_cast %c0_i32 : i32 to index
    %c0_36 = arith.constant 0 : index
    %c0_37 = arith.constant 0 : index
    %70 = vector.load %arg12[%69, %c0_36, %c0_37] : memref<2x1x128xf32, #tpu.memory_space<vmem>>, vector<1x1x128xf32>
    %71 = vector.shape_cast %70 : vector<1x1x128xf32> to vector<1x128xf32>
    %72 = arith.index_cast %c0_i32 : i32 to index
    %c0_38 = arith.constant 0 : index
    %c0_39 = arith.constant 0 : index
    %73 = vector.load %arg13[%72, %c0_38, %c0_39] : memref<2x1x128xf32, #tpu.memory_space<vmem>>, vector<1x1x128xf32>
    %74 = vector.shape_cast %73 : vector<1x1x128xf32> to vector<1x128xf32>
    %cst_40 = arith.constant dense<0.000000e+00> : vector<8xf32>
    %75 = vector.multi_reduction <add>, %68, %cst_40 [1] : vector<8x128xf32> to vector<8xf32>
    %76 = vector.shape_cast %75 : vector<8xf32> to vector<8x1xf32>
    %cst_41 = arith.constant 3.125000e-02 : f32
    %77 = vector.broadcast %cst_41 : f32 to vector<8x1xf32>
    %78 = arith.mulf %76, %77 : vector<8x1xf32>
    %79 = arith.mulf %68, %68 : vector<8x128xf32>
    %cst_42 = arith.constant dense<0.000000e+00> : vector<8xf32>
    %80 = vector.multi_reduction <add>, %79, %cst_42 [1] : vector<8x128xf32> to vector<8xf32>
    %81 = vector.shape_cast %80 : vector<8xf32> to vector<8x1xf32>
    %cst_43 = arith.constant 3.125000e-02 : f32
    %82 = vector.broadcast %cst_43 : f32 to vector<8x1xf32>
    %83 = arith.mulf %81, %82 : vector<8x1xf32>
    %84 = arith.mulf %78, %78 : vector<8x1xf32>
    %85 = arith.subf %83, %84 : vector<8x1xf32>
    %cst_44 = arith.constant 0.000000e+00 : f32
    %86 = vector.broadcast %cst_44 : f32 to vector<8x1xf32>
    %87 = arith.maximumf %85, %86 : vector<8x1xf32>
    %88 = vector.broadcast %78 : vector<8x1xf32> to vector<8x128xf32>
    %89 = arith.subf %68, %88 : vector<8x128xf32>
    %cst_45 = arith.constant 9.99999996E-13 : f32
    %90 = vector.broadcast %cst_45 : f32 to vector<8x1xf32>
    %91 = arith.addf %87, %90 : vector<8x1xf32>
    %92 = math.rsqrt %91 : vector<8x1xf32>
    %93 = vector.broadcast %92 : vector<8x1xf32> to vector<8x128xf32>
    %94 = arith.mulf %89, %93 : vector<8x128xf32>
    %95 = vector.broadcast %71 : vector<1x128xf32> to vector<8x128xf32>
    %96 = arith.mulf %94, %95 : vector<8x128xf32>
    %97 = vector.broadcast %74 : vector<1x128xf32> to vector<8x128xf32>
    %98 = arith.addf %96, %97 : vector<8x128xf32>
    %c1_i32 = arith.constant 1 : i32
    %cst_46 = arith.constant dense<0.000000e+00> : vector<8x128xf32>
    %99 = tpu.matmul %98, %0, %cst_46 {dimension_numbers = #tpu.dot_dimension_numbers<[1], [0], [0], [1], [0, 0, 1, 1], [], []>} : vector<8x128xf32>, vector<128x128xf32>, vector<8x128xf32> -> vector<8x128xf32>
    %cst_47 = arith.constant dense<0.000000e+00> : vector<8x128xf32>
    %100 = tpu.matmul %98, %1, %cst_47 {dimension_numbers = #tpu.dot_dimension_numbers<[1], [0], [0], [1], [0, 0, 1, 1], [], []>} : vector<8x128xf32>, vector<128x128xf32>, vector<8x128xf32> -> vector<8x128xf32>
    %cst_48 = arith.constant dense<0.000000e+00> : vector<8x128xf32>
    %101 = tpu.matmul %2, %99, %cst_48 {dimension_numbers = #tpu.dot_dimension_numbers<[1], [0], [0], [1], [0, 0, 1, 1], [], []>} : vector<8x8xf32>, vector<8x128xf32>, vector<8x128xf32> -> vector<8x128xf32>
    %cst_49 = arith.constant dense<0.000000e+00> : vector<8x128xf32>
    %102 = tpu.matmul %3, %100, %cst_49 {dimension_numbers = #tpu.dot_dimension_numbers<[1], [0], [0], [1], [0, 0, 1, 1], [], []>} : vector<8x8xf32>, vector<8x128xf32>, vector<8x128xf32> -> vector<8x128xf32>
    %103 = arith.subf %101, %102 : vector<8x128xf32>
    %104 = arith.addf %103, %98 : vector<8x128xf32>
    %105 = arith.index_cast %c1_i32 : i32 to index
    %c0_50 = arith.constant 0 : index
    %c0_51 = arith.constant 0 : index
    %106 = vector.load %arg6[%105, %c0_50, %c0_51] : memref<2x1x128xf32, #tpu.memory_space<vmem>>, vector<1x1x128xf32>
    %107 = vector.shape_cast %106 : vector<1x1x128xf32> to vector<1x128xf32>
    %108 = arith.index_cast %c1_i32 : i32 to index
    %c0_52 = arith.constant 0 : index
    %c0_53 = arith.constant 0 : index
    %109 = vector.load %arg7[%108, %c0_52, %c0_53] : memref<2x1x128xf32, #tpu.memory_space<vmem>>, vector<1x1x128xf32>
    %110 = vector.shape_cast %109 : vector<1x1x128xf32> to vector<1x128xf32>
    %cst_54 = arith.constant dense<0.000000e+00> : vector<8xf32>
    %111 = vector.multi_reduction <add>, %104, %cst_54 [1] : vector<8x128xf32> to vector<8xf32>
    %112 = vector.shape_cast %111 : vector<8xf32> to vector<8x1xf32>
    %cst_55 = arith.constant 3.125000e-02 : f32
    %113 = vector.broadcast %cst_55 : f32 to vector<8x1xf32>
    %114 = arith.mulf %112, %113 : vector<8x1xf32>
    %115 = arith.mulf %104, %104 : vector<8x128xf32>
    %cst_56 = arith.constant dense<0.000000e+00> : vector<8xf32>
    %116 = vector.multi_reduction <add>, %115, %cst_56 [1] : vector<8x128xf32> to vector<8xf32>
    %117 = vector.shape_cast %116 : vector<8xf32> to vector<8x1xf32>
    %cst_57 = arith.constant 3.125000e-02 : f32
    %118 = vector.broadcast %cst_57 : f32 to vector<8x1xf32>
    %119 = arith.mulf %117, %118 : vector<8x1xf32>
    %120 = arith.mulf %114, %114 : vector<8x1xf32>
    %121 = arith.subf %119, %120 : vector<8x1xf32>
    %cst_58 = arith.constant 0.000000e+00 : f32
    %122 = vector.broadcast %cst_58 : f32 to vector<8x1xf32>
    %123 = arith.maximumf %121, %122 : vector<8x1xf32>
    %124 = vector.broadcast %114 : vector<8x1xf32> to vector<8x128xf32>
    %125 = arith.subf %104, %124 : vector<8x128xf32>
    %cst_59 = arith.constant 9.99999996E-13 : f32
    %126 = vector.broadcast %cst_59 : f32 to vector<8x1xf32>
    %127 = arith.addf %123, %126 : vector<8x1xf32>
    %128 = math.rsqrt %127 : vector<8x1xf32>
    %129 = vector.broadcast %128 : vector<8x1xf32> to vector<8x128xf32>
    %130 = arith.mulf %125, %129 : vector<8x128xf32>
    %131 = vector.broadcast %107 : vector<1x128xf32> to vector<8x128xf32>
    %132 = arith.mulf %130, %131 : vector<8x128xf32>
    %133 = vector.broadcast %110 : vector<1x128xf32> to vector<8x128xf32>
    %134 = arith.addf %132, %133 : vector<8x128xf32>
    %135 = arith.index_cast %c1_i32 : i32 to index
    %c0_60 = arith.constant 0 : index
    %c0_61 = arith.constant 0 : index
    %136 = vector.load %arg8[%135, %c0_60, %c0_61] : memref<2x128x128xf32, #tpu.memory_space<vmem>>, vector<1x128x128xf32>
    %137 = vector.shape_cast %136 : vector<1x128x128xf32> to vector<128x128xf32>
    %cst_62 = arith.constant dense<0.000000e+00> : vector<8x128xf32>
    %138 = tpu.matmul %134, %137, %cst_62 {dimension_numbers = #tpu.dot_dimension_numbers<[1], [0], [0], [1], [0, 0, 1, 1], [], []>} : vector<8x128xf32>, vector<128x128xf32>, vector<8x128xf32> -> vector<8x128xf32>
    %139 = arith.index_cast %c1_i32 : i32 to index
    %c0_63 = arith.constant 0 : index
    %c0_64 = arith.constant 0 : index
    %140 = vector.load %arg9[%139, %c0_63, %c0_64] : memref<2x1x128xf32, #tpu.memory_space<vmem>>, vector<1x1x128xf32>
    %141 = vector.shape_cast %140 : vector<1x1x128xf32> to vector<1x128xf32>
    %142 = vector.broadcast %141 : vector<1x128xf32> to vector<8x128xf32>
    %143 = arith.addf %138, %142 : vector<8x128xf32>
    %cst_65 = arith.constant 5.000000e-01 : f32
    %144 = vector.broadcast %cst_65 : f32 to vector<8x128xf32>
    %145 = arith.mulf %144, %143 : vector<8x128xf32>
    %cst_66 = arith.constant 0.707106769 : f32
    %146 = vector.broadcast %cst_66 : f32 to vector<8x128xf32>
    %147 = arith.mulf %143, %146 : vector<8x128xf32>
    %148 = math.erf %147 : vector<8x128xf32>
    %cst_67 = arith.constant 1.000000e+00 : f32
    %149 = vector.broadcast %cst_67 : f32 to vector<8x128xf32>
    %150 = arith.addf %149, %148 : vector<8x128xf32>
    %151 = arith.mulf %145, %150 : vector<8x128xf32>
    %152 = arith.index_cast %c1_i32 : i32 to index
    %c0_68 = arith.constant 0 : index
    %c0_69 = arith.constant 0 : index
    %153 = vector.load %arg10[%152, %c0_68, %c0_69] : memref<2x128x128xf32, #tpu.memory_space<vmem>>, vector<1x128x128xf32>
    %154 = vector.shape_cast %153 : vector<1x128x128xf32> to vector<128x128xf32>
    %cst_70 = arith.constant dense<0.000000e+00> : vector<8x128xf32>
    %155 = tpu.matmul %151, %154, %cst_70 {dimension_numbers = #tpu.dot_dimension_numbers<[1], [0], [0], [1], [0, 0, 1, 1], [], []>} : vector<8x128xf32>, vector<128x128xf32>, vector<8x128xf32> -> vector<8x128xf32>
    %156 = arith.index_cast %c1_i32 : i32 to index
    %c0_71 = arith.constant 0 : index
    %c0_72 = arith.constant 0 : index
    %157 = vector.load %arg11[%156, %c0_71, %c0_72] : memref<2x1x128xf32, #tpu.memory_space<vmem>>, vector<1x1x128xf32>
    %158 = vector.shape_cast %157 : vector<1x1x128xf32> to vector<1x128xf32>
    %159 = vector.broadcast %158 : vector<1x128xf32> to vector<8x128xf32>
    %160 = arith.addf %155, %159 : vector<8x128xf32>
    %161 = arith.addf %160, %134 : vector<8x128xf32>
    %162 = arith.index_cast %c1_i32 : i32 to index
    %c0_73 = arith.constant 0 : index
    %c0_74 = arith.constant 0 : index
    %163 = vector.load %arg12[%162, %c0_73, %c0_74] : memref<2x1x128xf32, #tpu.memory_space<vmem>>, vector<1x1x128xf32>
    %164 = vector.shape_cast %163 : vector<1x1x128xf32> to vector<1x128xf32>
    %165 = arith.index_cast %c1_i32 : i32 to index
    %c0_75 = arith.constant 0 : index
    %c0_76 = arith.constant 0 : index
    %166 = vector.load %arg13[%165, %c0_75, %c0_76] : memref<2x1x128xf32, #tpu.memory_space<vmem>>, vector<1x1x128xf32>
    %167 = vector.shape_cast %166 : vector<1x1x128xf32> to vector<1x128xf32>
    %cst_77 = arith.constant dense<0.000000e+00> : vector<8xf32>
    %168 = vector.multi_reduction <add>, %161, %cst_77 [1] : vector<8x128xf32> to vector<8xf32>
    %169 = vector.shape_cast %168 : vector<8xf32> to vector<8x1xf32>
    %cst_78 = arith.constant 3.125000e-02 : f32
    %170 = vector.broadcast %cst_78 : f32 to vector<8x1xf32>
    %171 = arith.mulf %169, %170 : vector<8x1xf32>
    %172 = arith.mulf %161, %161 : vector<8x128xf32>
    %cst_79 = arith.constant dense<0.000000e+00> : vector<8xf32>
    %173 = vector.multi_reduction <add>, %172, %cst_79 [1] : vector<8x128xf32> to vector<8xf32>
    %174 = vector.shape_cast %173 : vector<8xf32> to vector<8x1xf32>
    %cst_80 = arith.constant 3.125000e-02 : f32
    %175 = vector.broadcast %cst_80 : f32 to vector<8x1xf32>
    %176 = arith.mulf %174, %175 : vector<8x1xf32>
    %177 = arith.mulf %171, %171 : vector<8x1xf32>
    %178 = arith.subf %176, %177 : vector<8x1xf32>
    %cst_81 = arith.constant 0.000000e+00 : f32
    %179 = vector.broadcast %cst_81 : f32 to vector<8x1xf32>
    %180 = arith.maximumf %178, %179 : vector<8x1xf32>
    %181 = vector.broadcast %171 : vector<8x1xf32> to vector<8x128xf32>
    %182 = arith.subf %161, %181 : vector<8x128xf32>
    %cst_82 = arith.constant 9.99999996E-13 : f32
    %183 = vector.broadcast %cst_82 : f32 to vector<8x1xf32>
    %184 = arith.addf %180, %183 : vector<8x1xf32>
    %185 = math.rsqrt %184 : vector<8x1xf32>
    %186 = vector.broadcast %185 : vector<8x1xf32> to vector<8x128xf32>
    %187 = arith.mulf %182, %186 : vector<8x128xf32>
    %188 = vector.broadcast %164 : vector<1x128xf32> to vector<8x128xf32>
    %189 = arith.mulf %187, %188 : vector<8x128xf32>
    %190 = vector.broadcast %167 : vector<1x128xf32> to vector<8x128xf32>
    %191 = arith.addf %189, %190 : vector<8x128xf32>
    %c2_i32 = arith.constant 2 : i32
    %192 = vector.shape_cast %191 : vector<8x128xf32> to vector<1x8x128xf32>
    %c0_83 = arith.constant 0 : index
    %c0_84 = arith.constant 0 : index
    %c0_85 = arith.constant 0 : index
    %193 = vector.load %arg14[%c0_83, %c0_84, %c0_85] : memref<1x8x128xf32, #tpu.memory_space<vmem>>, vector<1x8x128xf32>
    tpu.vector_store %arg14[%c0_83, %c0_84, %c0_85], %192 {strides = array<i32>} : memref<1x8x128xf32, #tpu.memory_space<vmem>>, vector<1x8x128xf32>,
    return
  }
  func.func @transform_0(%arg0: i32) -> (i32, i32, i32) {
    %c0_i32 = arith.constant 0 : i32
    %c0_i32_0 = arith.constant 0 : i32
    %c0_i32_1 = arith.constant 0 : i32
    return %arg0, %c0_i32, %c0_i32_0 : i32, i32, i32
  }
  func.func @transform_1(%arg0: i32) -> (i32, i32) {
    %c0_i32 = arith.constant 0 : i32
    %c0_i32_0 = arith.constant 0 : i32
    %c0_i32_1 = arith.constant 0 : i32
    return %c0_i32, %c0_i32_0 : i32, i32
  }
  func.func @transform_2(%arg0: i32) -> (i32, i32) {
    %c0_i32 = arith.constant 0 : i32
    %c0_i32_0 = arith.constant 0 : i32
    %c0_i32_1 = arith.constant 0 : i32
    return %c0_i32, %c0_i32_0 : i32, i32
  }
  func.func @transform_3(%arg0: i32) -> (i32, i32) {
    %c0_i32 = arith.constant 0 : i32
    %c0_i32_0 = arith.constant 0 : i32
    %c0_i32_1 = arith.constant 0 : i32
    return %c0_i32, %c0_i32_0 : i32, i32
  }
  func.func @transform_4(%arg0: i32) -> (i32, i32) {
    %c0_i32 = arith.constant 0 : i32
    %c0_i32_0 = arith.constant 0 : i32
    %c0_i32_1 = arith.constant 0 : i32
    return %c0_i32, %c0_i32_0 : i32, i32
  }
  func.func @transform_5(%arg0: i32) -> (i32, i32, i32) {
    %c0_i32 = arith.constant 0 : i32
    %c0_i32_0 = arith.constant 0 : i32
    %c0_i32_1 = arith.constant 0 : i32
    %c0_i32_2 = arith.constant 0 : i32
    return %c0_i32, %c0_i32_0, %c0_i32_1 : i32, i32, i32
  }
  func.func @transform_6(%arg0: i32) -> (i32, i32, i32) {
    %c0_i32 = arith.constant 0 : i32
    %c0_i32_0 = arith.constant 0 : i32
    %c0_i32_1 = arith.constant 0 : i32
    %c0_i32_2 = arith.constant 0 : i32
    return %c0_i32, %c0_i32_0, %c0_i32_1 : i32, i32, i32
  }
  func.func @transform_7(%arg0: i32) -> (i32, i32, i32) {
    %c0_i32 = arith.constant 0 : i32
    %c0_i32_0 = arith.constant 0 : i32
    %c0_i32_1 = arith.constant 0 : i32
    %c0_i32_2 = arith.constant 0 : i32
    return %c0_i32, %c0_i32_0, %c0_i32_1 : i32, i32, i32
  }
  func.func @transform_8(%arg0: i32) -> (i32, i32, i32) {
    %c0_i32 = arith.constant 0 : i32
    %c0_i32_0 = arith.constant 0 : i32
    %c0_i32_1 = arith.constant 0 : i32
    %c0_i32_2 = arith.constant 0 : i32
    return %c0_i32, %c0_i32_0, %c0_i32_1 : i32, i32, i32
  }
  func.func @transform_9(%arg0: i32) -> (i32, i32, i32) {
    %c0_i32 = arith.constant 0 : i32
    %c0_i32_0 = arith.constant 0 : i32
    %c0_i32_1 = arith.constant 0 : i32
    %c0_i32_2 = arith.constant 0 : i32
    return %c0_i32, %c0_i32_0, %c0_i32_1 : i32, i32, i32
  }
  func.func @transform_10(%arg0: i32) -> (i32, i32, i32) {
    %c0_i32 = arith.constant 0 : i32
    %c0_i32_0 = arith.constant 0 : i32
    %c0_i32_1 = arith.constant 0 : i32
    %c0_i32_2 = arith.constant 0 : i32
    return %c0_i32, %c0_i32_0, %c0_i32_1 : i32, i32, i32
  }
  func.func @transform_11(%arg0: i32) -> (i32, i32, i32) {
    %c0_i32 = arith.constant 0 : i32
    %c0_i32_0 = arith.constant 0 : i32
    %c0_i32_1 = arith.constant 0 : i32
    %c0_i32_2 = arith.constant 0 : i32
    return %c0_i32, %c0_i32_0, %c0_i32_1 : i32, i32, i32
  }
  func.func @transform_12(%arg0: i32) -> (i32, i32, i32) {
    %c0_i32 = arith.constant 0 : i32
    %c0_i32_0 = arith.constant 0 : i32
    %c0_i32_1 = arith.constant 0 : i32
    %c0_i32_2 = arith.constant 0 : i32
    return %c0_i32, %c0_i32_0, %c0_i32_1 : i32, i32, i32
  }
  func.func @transform_13(%arg0: i32) -> (i32, i32, i32) {
    %c0_i32 = arith.constant 0 : i32
    %c0_i32_0 = arith.constant 0 : i32
    %c0_i32_1 = arith.constant 0 : i32
    return %arg0, %c0_i32, %c0_i32_0 : i32, i32, i32
  }
}

</mosaic_0001>

<bundles_post_ra>
// kernel: tpu_custom_call.1
= control target key start
LH: loop header
LB: loop body
LE: loop exit
PB: predicated region body
PF: predicated region fallthrough
CT: control target
= control target key end

     0   :  { %s3337_s0 = inlined_call_operand.hbm [shape: f32[2,8,128], index: 0, kind: input, shape index: {}]   ;;  %s3338_s1 = inlined_call_operand.hbm [shape: f32[128,128], index: 1, kind: input, shape index: {}]   ;;  %s3339_s2 = inlined_call_operand.hbm [shape: f32[128,128], index: 2, kind: input, shape index: {}]   ;;  %s3340_s3 = inlined_call_operand.hbm [shape: f32[8,8], index: 3, kind: input, shape index: {}]   ;;  %s3341_s4 = inlined_call_operand.hbm [shape: f32[8,8], index: 4, kind: input, shape index: {}]   ;;  %s3342_s5 = inlined_call_operand.vmem [shape: f32[2,1,128], index: 5, kind: input, shape index: {}]   ;;  %s3343_s6 = inlined_call_operand.vmem [shape: f32[2,1,128], index: 6, kind: input, shape index: {}]   ;;  %s3344_s7 = inlined_call_operand.hbm [shape: f32[2,128,128], index: 7, kind: input, shape index: {}]   ;;  %s3345_s8 = inlined_call_operand.vmem [shape: f32[2,1,128], index: 8, kind: input, shape index: {}]   ;;  %s3346_s9 = inlined_call_operand.hbm [shape: f32[2,128,128], index: 9, kind: input, shape index: {}]   ;;  %s3347_s10 = inlined_call_operand.vmem [shape: f32[2,1,128], index: 10, kind: input, shape index: {}]   ;;  %s3348_s11 = inlined_call_operand.vmem [shape: f32[2,1,128], index: 11, kind: input, shape index: {}]   ;;  %s3349_s12 = inlined_call_operand.vmem [shape: f32[2,1,128], index: 12, kind: input, shape index: {}]   ;;  %s3350_s13 = inlined_call_operand.hbm [shape: f32[2,8,128], index: 13, kind: output, shape index: {}]  }
   0x1   :  { %3356 = sst [smem:[#allocation21_spill]] %s3338_s1 }
   0x2   :  { %3357 = sst [smem:[#allocation22_spill]] %s3339_s2 }
   0x3   :  { %3358 = sst [smem:[#allocation23_spill]] %s3340_s3 }
   0x4   :  { %3359 = sst [smem:[#allocation24_spill]] %s3341_s4 }
   0x5   :  { %3360 = sst [smem:[#allocation25_spill]] %s3344_s7 }
   0x6   :  { %3361 = sst [smem:[#allocation26_spill]] %s3346_s9 }
   0x7   :  { %3362 = sst [smem:[#allocation27_spill]] %s3350_s13 }
   0x8   :  { %18 = vsyncpa [#allocation3], 0 }
   0x9   :  { %20 = vsyncpa [#allocation3 + $0x1], 0 }
   0xa   :  { %21 = vsyncpa [#allocation6], 0 }
   0xb   :  { %22 = vsyncpa [#allocation9], 0 }
   0xc   :  { %23 = vsyncpa [#allocation12], 0 }
   0xd   :  { %24 = vsyncpa [#allocation4], 0 }
   0xe   :  { %26 = vsyncpa [#allocation4 + $0x1], 0  ;;  %s2756_s25 = smov 0   ;;  %s2758_s26 = smov 0  }
   0xf   :  { %s2760_s27 = smov 0   ;;  %s2762_s28 = smov 0  }
  0x10 LB: > { %s2674_s29 = smov [#allocation5]   ;;  %s2777_s14 = sadd.s32 4294967295, %s2672_s28   ;;  %s2672_s28 = sphi %s2762_s28, %s3394_s28   ;;  %s2668_s27 = sphi %s2760_s27, %s3393_s27   ;;  %s2664_s26 = sphi %s2758_s26, %s3392_s26   ;;  %s2660_s25 = sphi %s2756_s25, %s3391_s25  }
  0x11   : > { %s353_s30 = sshll.u32 %s2674_s29, 4  ;;  %p1800_p0 = scmp.ge.s32.totalorder %s2672_s28, 1  ;;  %s354_s30 = int_to_ptr.vmem [resolvable:$true] %s353_s30 }
  0x12   : > { %p3352_p1 = scmp.eq.s32.totalorder %s2777_s14, 0  ;;  %p341_p2 = scmp.lt.s32.totalorder %s2672_s28, 3 }
  0x13   : > { %s2675_s16 = smov [#allocation8]   ;;  %s2676_s19 = smov [#allocation11]  }
  0x14   : > { %p2782_p3 = pnand %p1800_p0, %p341_p2  ;;  %s380_s17 = sshll.u32 %s2675_s16, 4  ;;  %s381_s17 = int_to_ptr.vmem [resolvable:$true] %s380_s17 }
  0x15   : > { %s407_s20 = sshll.u32 %s2676_s19, 4  ;;  %s2423_s22 = scalar_lea.vmem %s354_s30, 2048  ;;  %s2795_s20 = int_to_ptr.vmem [resolvable:$true] %s407_s20 }
  0x16   : > { %s3363_s15 = scalar_select %p2782_p3, 1, 0 }
  0x17   : > { %p2317_p5 = pneg %p2782_p3  ;;  %p2424_p8 = scmp.ne.s32.totalorder %s354_s30, %s2423_s22 }
  0x18   : > { %p2431_p11 = scmp.lt.s32.totalorder %s354_s30, %s354_s30  ;;  %p2432_p12 = scmp.lt.s32.totalorder %s2423_s22, %s2423_s22 }
  0x19   : > { %p2791_p6 = pnand %p2317_p5, %p3352_p1 }
  0x1a   : > { %p2433_p13 = por %p2432_p12, %p2431_p11 }
  0x1b   : > { %p2799_p7 = pneg %p2791_p6 }
  0x1d   : > { %p2426_p9 = pnand %p2424_p8, %p2799_p7 }
  0x1f   : > { %p2427_p10 = pneg %p2426_p9 }
  0x21   : > { %p2434_p0 = pnand %p2433_p13, %p2427_p10 }
  0x23   : > { %2437 = shalt.err (!%p2434_p0)
}
  0x24   : > { %s2677_s23 = smov 128   ;;  %s2678_s24 = smov 8  }
  0x25   : > { %s3366_s1 = sld [smem:[#allocation21_spill]]  ;;  %s2449_s19 = scalar_lea.vmem %s381_s17, 128 }
  0x26   : > { %p2450_p2 = scmp.ne.s32.totalorder %s381_s17, %s2449_s19  ;;  %p2457_p9 = scmp.lt.s32.totalorder %s381_s17, %s381_s17 }
  0x27   : > { %p2458_p10 = scmp.lt.s32.totalorder %s2449_s19, %s2449_s19 }
  0x28   : > { %p2452_p5 = pnand %p2450_p2, %p2799_p7 }
  0x29   : > { %p2459_p11 = por %p2458_p10, %p2457_p9 }
  0x2a   : > { %p2453_p8 = pneg %p2452_p5 }
  0x2b   : > { %2320 = dma.hbm_to_vmem [thread:$0]  (!%p2791_p6), %s3366_s1, 2048, %s354_s30, [#allocation6], %s2677_s23, %s2677_s23, %s2678_s24  }
  0x2c   : > { %p2460_p12 = pnand %p2459_p11, %p2453_p8 }
  0x2e   : > { %2463 = shalt.err (!%p2460_p12)
}
  0x2f   : > { %s3367_s3 = sld [smem:[#allocation23_spill]]  ;;  %s2475_s30 = scalar_lea.vmem %s2795_s20, 4096 }
  0x30   : > { %p2476_p13 = scmp.ne.s32.totalorder %s2795_s20, %s2475_s30  ;;  %p2483_p5 = scmp.lt.s32.totalorder %s2795_s20, %s2795_s20 }
  0x31   : > { %p2484_p9 = scmp.lt.s32.totalorder %s2475_s30, %s2475_s30 }
  0x32   : > { %p2478_p0 = pnand %p2476_p13, %p2799_p7 }
  0x33   : > { %p2485_p8 = por %p2484_p9, %p2483_p5 }
  0x34   : > { %p2479_p2 = pneg %p2478_p0 }
  0x35   : > { %2326 = dma.hbm_to_vmem [thread:$0]  (!%p2791_p6), %s3367_s3, 128, %s381_s17, [#allocation9]  }
  0x36   : > { %p2486_p10 = pnand %p2485_p8, %p2479_p2 }
  0x38   : > { %2489 = shalt.err (!%p2486_p10)
}
  0x39   : > { %s3368_s7 = sld [smem:[#allocation25_spill]]  ;;  %s2679_s17 = smov [#allocation7]  }
  0x3a   : > { %s366_s16 = sshll.u32 %s2679_s17, 4  ;;  %s2680_s19 = smov [#allocation10]   ;;  %s367_s16 = int_to_ptr.vmem [resolvable:$true] %s366_s16 }
  0x3b   : > { %s391_s22 = sshll.u32 %s2680_s19, 4  ;;  %s2501_s30 = scalar_lea.vmem %s367_s16, 2048  ;;  %s392_s22 = int_to_ptr.vmem [resolvable:$true] %s391_s22 }
  0x3c   : > { %p2502_p11 = scmp.ne.s32.totalorder %s367_s16, %s2501_s30  ;;  %p2509_p0 = scmp.lt.s32.totalorder %s367_s16, %s367_s16 }
  0x3d   : > { %p2510_p2 = scmp.lt.s32.totalorder %s2501_s30, %s2501_s30 }
  0x3e   : > { %p2504_p12 = pnand %p2502_p11, %p2799_p7 }
  0x3f   : > { %2332 = dma.hbm_to_vmem [thread:$0]  (!%p2791_p6), %s3368_s7, 4096, %s2795_s20, [#allocation12], %s2677_s23, %s2677_s23, %s2678_s24  }
  0x40   : > { %p2505_p13 = pneg %p2504_p12  ;;  %p2511_p5 = por %p2510_p2, %p2509_p0 }
  0x42   : > { %p2512_p9 = pnand %p2511_p5, %p2505_p13 }
  0x44   : > { %2515 = shalt.err (!%p2512_p9)
}
  0x45   : > { %s3369_s2 = sld [smem:[#allocation22_spill]]  ;;  %s2527_s29 = scalar_lea.vmem %s392_s22, 128 }
  0x46   : > { %p2528_p8 = scmp.ne.s32.totalorder %s392_s22, %s2527_s29  ;;  %p2535_p12 = scmp.lt.s32.totalorder %s392_s22, %s392_s22 }
  0x47   : > { %p2536_p0 = scmp.lt.s32.totalorder %s2527_s29, %s2527_s29 }
  0x48   : > { %p2530_p10 = pnand %p2528_p8, %p2799_p7 }
  0x49   : > { %p2537_p13 = por %p2536_p0, %p2535_p12 }
  0x4a   : > { %p2531_p11 = pneg %p2530_p10 }
  0x4b   : > { %2323 = dma.hbm_to_vmem [thread:$0]  (!%p2791_p6), %s3369_s2, 2048, %s367_s16, [#allocation6], %s2677_s23, %s2677_s23, %s2678_s24  }
  0x4c   : > { %p2538_p2 = pnand %p2537_p13, %p2531_p11 }
  0x4e   : > { %2541 = shalt.err (!%p2538_p2)
}
  0x4f   : > { %s3370_s4 = sld [smem:[#allocation24_spill]]  ;;  %s2681_s30 = smov [#allocation13]  }
  0x50   : > { %s423_s16 = sshll.u32 %s2681_s30, 4  ;;  %s424_s16 = int_to_ptr.vmem [resolvable:$true] %s423_s16 }
  0x51   : > { %s2553_s20 = scalar_lea.vmem %s424_s16, 4096  ;;  %p2561_p10 = scmp.lt.s32.totalorder %s424_s16, %s424_s16 }
  0x52   : > { %p2554_p5 = scmp.ne.s32.totalorder %s424_s16, %s2553_s20  ;;  %p2562_p4 = scmp.lt.s32.totalorder %s2553_s20, %s2553_s20 }
  0x54   : > { %p2556_p9 = pnand %p2554_p5, %p2799_p7  ;;  %p2563_p12 = por %p2562_p4, %p2561_p10 }
  0x55   : > { %2329 = dma.hbm_to_vmem [thread:$0]  (!%p2791_p6), %s3370_s4, 128, %s392_s22, [#allocation9]  }
  0x56   : > { %p2557_p8 = pneg %p2556_p9 }
  0x58   : > { %p2564_p11 = pnand %p2563_p12, %p2557_p8 }
  0x5a   : > { %2567 = shalt.err (!%p2564_p11)
}
  0x5b   : > { %s3371_s9 = sld [smem:[#allocation26_spill]]  ;;  %s1799_s18 = sadd.s32 4294967294, %s2672_s28  }
  0x5c   : > { %s2864_s21 = sadd.s32 1, %s2672_s28   ;;  %s39_s17 = sadd.s32 1, %s2668_s27 }
  0x5d   : > { %s36_s29 = ssub.s32 %s2672_s28, %s2864_s21  ;;  %p46_p7 = scmp.ne.s32.totalorder %s2668_s27, %s2664_s26 }
  0x5e   : > { %p37_p4 = scmp.eq.s32.totalorder %s36_s29, 0  ;;  %p47_p0 = scmp.eq.s32.totalorder %s2672_s28, 0 }
  0x5f   : > { %p52_p13 = scmp.ne.s32.totalorder %s2664_s26, %s2660_s25  ;;  %p328_p5 = scmp.eq.s32.totalorder %s2777_s14, 1 }
  0x60   : > { %s2875_s19 = scalar_select %p37_p4, %s2668_s27, %s39_s17  }
  0x61   : > { %2335 = dma.hbm_to_vmem [thread:$0]  (!%p2791_p6), %s3371_s9, 4096, %s424_s16, [#allocation12], %s2677_s23, %s2677_s23, %s2678_s24  }
  0x62   : > { %3372 = sst [smem:[#allocation20_spill]] %s2875_s19  ;;  %p2877_p2 = por %p47_p0, %p46_p7 }
  0x63   : > { %p2883_p6 = por %p3352_p1, %p52_p13  ;;  %p334_p9 = scmp.eq.s32.totalorder %s1799_s18, 1 }
  0x64   : > { %p2350_p8 = scmp.lt.s32.totalorder %s2672_s28, 2  ;;  %s446_s24 = sand.u32 1, %s2668_s27  }
  0x65   : > { %s3374_s23 = scalar_select %p2883_p6, 1, 0 }
  0x66   : > { %p2890_p10 = por %p328_p5, %p46_p7  ;;  %p2894_p12 = por %p334_p9, %p52_p13 }
  0x67   : > { %s1808_s13 = sshll.u32 %s446_s24, 3  ;;  %s1809_s22 = sshll.u32 %s2672_s28, 7 }
  0x68   : > { %s3375_s16 = scalar_select %p2890_p10, 1, 0 }
  0x69   : > { %s3376_s20 = scalar_select %p2894_p12, 1, 0 }
  0x6a   : > { %s2902_s1 = scalar_lea.hbm %s3337_s0, %s1809_s22  ;;  %s450_s18 = scalar_lea.vmem [#allocation2], %s1808_s13 }
  0x6b   : > { %s457_s2 = sshll.u32 %s450_s18, 4  ;;  %p2906_p11 = pnand %p2350_p8, %p2877_p2  ;;  %s458_s2 = int_to_ptr.vmem [resolvable:$true] %s457_s2 }
  0x6c   : > { %s447_s4 = scalar_lea.sflag [#allocation3], %s446_s24  ;;  %s2568_s7 = scalar_lea.hbm %s2902_s1, 128 }
  0x6d   : > { %p2569_p4 = scmp.ne.s32.totalorder %s2902_s1, %s2568_s7  ;;  %p2570_p7 = pneg %p2906_p11 }
  0x6e   : > { %s2573_s17 = scalar_lea.hbm %s3337_s0, 256  ;;  %p2574_p5 = scmp.lt.s32.totalorder %s2902_s1, %s3337_s0 }
  0x6f   : > { %p2571_p0 = pnand %p2570_p7, %p2569_p4  ;;  %p2575_p2 = scmp.lt.s32.totalorder %s2573_s17, %s2568_s7 }
  0x71   : > { %p2572_p13 = pneg %p2571_p0  ;;  %p2576_p9 = por %p2575_p2, %p2574_p5 }
  0x73   : > { %p2577_p8 = pnand %p2576_p9, %p2572_p13 }
  0x75   : > { %2580 = shalt.err (!%p2577_p8)
}
  0x76   : > { %s2581_s30 = scalar_lea.vmem %s458_s2, 128  ;;  %s2682_s24 = smov [#allocation2]  }
  0x77   : > { %p2582_p1 = scmp.ne.s32.totalorder %s458_s2, %s2581_s30  ;;  %s2586_s9 = sshll.u32 %s2682_s24, 4  ;;  %s2587_s9 = int_to_ptr.vmem [resolvable:$false] %s2586_s9 }
  0x78   : > { %s2588_s19 = scalar_lea.vmem %s2587_s9, 256  ;;  %p2589_p4 = scmp.lt.s32.totalorder %s458_s2, %s2587_s9 }
  0x79   : > { %p2584_p12 = pnand %p2582_p1, %p2570_p7  ;;  %p2590_p0 = scmp.lt.s32.totalorder %s2588_s19, %s2581_s30 }
  0x7b   : > { %p2585_p10 = pneg %p2584_p12  ;;  %p2591_p6 = por %p2590_p0, %p2589_p4 }
  0x7d   : > { %p2592_p3 = pnand %p2591_p6, %p2585_p10 }
  0x7f   : > { %2595 = shalt.err (!%p2592_p3)
}
  0x80   : > { %2339 = dma.hbm_to_vmem [thread:$0]  (!%p2906_p11), %s2902_s1, 128, %s458_s2, %s447_s4  }
  0x81   : > { %p3378_p13 = scmp.ne.s32.totalorder %s3363_s15, 0 }
  0x82   : > { %s2927_s7 = sand.u32 (!%p3378_p13), 1, %s2664_s26   ;;  %p3379_p1 = scmp.ne.s32.totalorder (!%p3378_p13), %s3374_s23, 0 }
  0x83   : > { %466 = sbr.rel (%p3378_p13) target bundleno = 2475 (0x9ab), region = 72  ;;  %s1811_s22 = sshll.u32 (!%p3378_p13), %s2927_s7, 3 }
  0x84   : > { %s469_s9 = scalar_lea.sflag (!%p3378_p13), [#allocation3], %s2927_s7  ;;  %s2933_s19 = scalar_lea.vmem (!%p3378_p13), [#allocation2], %s1811_s22 }
  0x88   : > { %2639 = dma.done.wait (%p3379_p1), %s469_s9, 128  }
  0x89   : > { %2641 = vsyncadd (%p3379_p1), %s469_s9, 4294967168  ;;  %p3380_p3 = scmp.eq.s32.totalorder %s2777_s14, 0 }
  0x8b   : > { %2643 = dma.done.wait (%p3380_p3), [#allocation6], 4096   ;;  %p3381_p6 = pmov %p3380_p3 }
  0x8c   : > { %p3382_p10 = pmov %p3380_p3 }
  0x8d   : > { %2645 = vsyncadd (%p3381_p6), [#allocation6], 4294963200 }
  0x8e   : > { %2647 = dma.done.wait (%p3382_p10), [#allocation9], 256   ;;  %p3383_p12 = pmov %p3380_p3 }
  0x8f   : > { %p3384_p11 = pmov %p3380_p3 }
  0x90   : > { %2649 = vsyncadd (%p3383_p12), [#allocation9], 4294967040 }
  0x91   : > { %2651 = dma.done.wait (%p3384_p11), [#allocation12], 8192   ;;  %p3385_p7 = pmov %p3380_p3 }
  0x92   : > { %v2683_v0 = vmov 0.0   ;;  %vm2684_vm0 = vmmov 0   ;;  %v2957_v1 = vld [vmem:[#allocation5 + $0x78] sm:$0xff]  ;;  %v2961_v3 = vld [vmem:[#allocation5 + $0x70] sm:$0xff]  ;;  %v2969_v5 = vld [vmem:[#allocation5 + $0x68] sm:$0xff]  ;;  %vm714_vm1 = vcmask 64512  }
  0x93   : > { %2653 = vsyncadd (%p3385_p7), [#allocation12], 4294959104  ;;  %1989 = vmatprep.subr.mxu0 %v2683_v0  ;;  %2024 = vmatprep.subr.mxu1 %v2683_v0  ;;  %v2959_v2 = vld [vmem:[#allocation7 + $0x78] sm:$0xff]  ;;  %v2965_v4 = vld [vmem:[#allocation7 + $0x70] sm:$0xff]  ;;  %s1842_s30 = sshll.u32 %s2777_s14, 7  ;;  %s538_s24 = scalar_lea.vmem [#allocation14], %s1811_s22 }
  0x94   : > { %2021 = vmatprep.mubr.msk.f32.mxu0 %vm2684_vm0, %v2683_v0  ;;  %2056 = vmatprep.mubr.msk.f32.mxu1 %vm2684_vm0, %v2683_v0  ;;  %v2971_v6 = vld [vmem:[#allocation7 + $0x68] sm:$0xff]  ;;  %v2977_v7 = vld [vmem:[#allocation5 + $0x60] sm:$0xff]  ;;  %v2985_v9 = vld [vmem:[#allocation5 + $0x58] sm:$0xff]  ;;  %s1672_s9 = sshll.u32 %s538_s24, 4  ;;  %s3386_s2 = sld [smem:[#allocation27_spill]]  ;;  %s1673_s9 = int_to_ptr.vmem [resolvable:$true] %s1672_s9 }
  0x95   : > { %1990 = vmatpush3.msra.mxu0 %v2957_v1  ;;  %2025 = vmatpush3.msra.mxu1 %v2959_v2  ;;  %v2979_v8 = vld [vmem:[#allocation7 + $0x60] sm:$0xff]  ;;  %v2987_v10 = vld [vmem:[#allocation7 + $0x58] sm:$0xff]  ;;  %v2993_v11 = vld [vmem:[#allocation5 + $0x50] sm:$0xff]  ;;  %s1659_s4 = scalar_lea.sflag [#allocation4], %s2927_s7  ;;  %s2596_s15 = scalar_lea.vmem %s1673_s9, 128 }
  0x96   : > { %1991 = vmatprep.subr.mxu0 %v2683_v0  ;;  %2026 = vmatprep.subr.mxu1 %v2683_v0  ;;  %v2995_v12 = vld [vmem:[#allocation7 + $0x50] sm:$0xff]  ;;  %v3001_v13 = vld [vmem:[#allocation5 + $0x48] sm:$0xff]  ;;  %v3009_v15 = vld [vmem:[#allocation5 + $0x40] sm:$0xff]  ;;  %p2597_p5 = scmp.ne.s32.totalorder %s1673_s9, %s2596_s15  ;;  %p3387_p2 = scmp.ne.s32.totalorder %s3375_s16, 0 }
  0x97   : > { %1992 = vmatpush3.msra.mxu0 %v2961_v3  ;;  %2027 = vmatpush3.msra.mxu1 %v2965_v4  ;;  %v3003_v14 = vld [vmem:[#allocation7 + $0x48] sm:$0xff]  ;;  %v3011_v16 = vld [vmem:[#allocation7 + $0x40] sm:$0xff]  ;;  %v3017_v17 = vld [vmem:[#allocation5 + $0x38] sm:$0xff]  ;;  %s2685_s23 = smov [#allocation14]  }
  0x98   : > { %1993 = vmatprep.subr.mxu0 %v2683_v0  ;;  %2028 = vmatprep.subr.mxu1 %v2683_v0  ;;  %v3019_v18 = vld [vmem:[#allocation7 + $0x38] sm:$0xff]  ;;  %v3025_v19 = vld [vmem:[#allocation5 + $0x30] sm:$0xff]  ;;  %v3033_v21 = vld [vmem:[#allocation5 + $0x28] sm:$0xff]  ;;  %p2598_p9 = pnand %p2597_p5, %p3387_p2  ;;  %s2600_s29 = sshll.u32 %s2685_s23, 4  ;;  %s2601_s29 = int_to_ptr.vmem [resolvable:$false] %s2600_s29 }
  0x99   : > { %1994 = vmatpush3.msra.mxu0 %v2969_v5  ;;  %2029 = vmatpush3.msra.mxu1 %v2971_v6  ;;  %v3027_v20 = vld [vmem:[#allocation7 + $0x30] sm:$0xff]  ;;  %v3035_v22 = vld [vmem:[#allocation7 + $0x28] sm:$0xff]  ;;  %v3041_v23 = vld [vmem:[#allocation5 + $0x20] sm:$0xff]  ;;  %s2602_s14 = scalar_lea.vmem %s2601_s29, 256  ;;  %p2603_p4 = scmp.lt.s32.totalorder %s1673_s9, %s2601_s29 }
  0x9a   : > { %1995 = vmatprep.subr.mxu0 %v2683_v0  ;;  %2030 = vmatprep.subr.mxu1 %v2683_v0  ;;  %v3043_v24 = vld [vmem:[#allocation7 + $0x20] sm:$0xff]  ;;  %v3049_v25 = vld [vmem:[#allocation5 + $0x18] sm:$0xff]  ;;  %v3057_v27 = vld [vmem:[#allocation5 + $0x10] sm:$0xff]  ;;  %s1670_s3 = scalar_lea.hbm %s3386_s2, %s1842_s30  ;;  %p2599_p8 = pneg %p2598_p9 }
  0x9b   : > { %1996 = vmatpush3.msra.mxu0 %v2977_v7  ;;  %2031 = vmatpush3.msra.mxu1 %v2979_v8  ;;  %v3051_v26 = vld [vmem:[#allocation7 + $0x18] sm:$0xff]  ;;  %v3059_v28 = vld [vmem:[#allocation7 + $0x10] sm:$0xff]  ;;  %v3065_v29 = vld [vmem:[#allocation5 + $0x8] sm:$0xff]  ;;  %p2604_p0 = scmp.lt.s32.totalorder %s2602_s14, %s2596_s15 }
  0x9c   : > { %1997 = vmatprep.subr.mxu0 %v2683_v0  ;;  %2032 = vmatprep.subr.mxu1 %v2683_v0  ;;  %v3067_v30 = vld [vmem:[#allocation7 + $0x8] sm:$0xff]  ;;  %v3073_v31 = vld [vmem:[#allocation5] sm:$0xff]  ;;  %v573_v33 = vld [vmem:[%s2933_s19] sm:$0xff] }
  0x9d   : > { %1998 = vmatpush3.msra.mxu0 %v2985_v9  ;;  %2033 = vmatpush3.msra.mxu1 %v2987_v10  ;;  %v3075_v32 = vld [vmem:[#allocation7] sm:$0xff]  ;;  %v3092_v35 = vld [vmem:[#allocation10] sm:$0xff]  ;;  %v906_v49 = vld [vmem:[#allocation11 + $0x68] sm:$0xff]  ;;  %p2605_p13 = por %p2604_p0, %p2603_p4 }
  0x9e   : > { %1999 = vmatprep.subr.mxu0 %v2683_v0  ;;  %2034 = vmatprep.subr.mxu1 %v2683_v0  ;;  %v3090_v34 = vld [vmem:[#allocation8] sm:$0xff]  ;;  %v908_v47 = vld [vmem:[#allocation11 + $0x78] sm:$0xff]  ;;  %v905_v50 = vld [vmem:[#allocation11 + $0x60] sm:$0xff] }
  0x9f   : > { %2000 = vmatpush3.msra.mxu0 %v2993_v11  ;;  %2035 = vmatpush3.msra.mxu1 %v2995_v12  ;;  %v907_v48 = vld [vmem:[#allocation11 + $0x70] sm:$0xff]  ;;  %v904_v51 = vld [vmem:[#allocation11 + $0x58] sm:$0xff]  ;;  %v902_v53 = vld [vmem:[#allocation11 + $0x48] sm:$0xff]  ;;  %p2606_p1 = pnand %p2605_p13, %p2599_p8 }
  0xa0   : > { %2001 = vmatprep.subr.mxu0 %v2683_v0  ;;  %2036 = vmatprep.subr.mxu1 %v2683_v0  ;;  %v903_v52 = vld [vmem:[#allocation11 + $0x50] sm:$0xff]  ;;  %v901_v54 = vld [vmem:[#allocation11 + $0x40] sm:$0xff]  ;;  %v900_v55 = vld [vmem:[#allocation11 + $0x38] sm:$0xff] }
  0xa1   : > { %2002 = vmatpush3.msra.mxu0 %v3001_v13  ;;  %2037 = vmatpush3.msra.mxu1 %v3003_v14  ;;  %v899_v56 = vld [vmem:[#allocation11 + $0x30] sm:$0xff]  ;;  %v898_v57 = vld [vmem:[#allocation11 + $0x28] sm:$0xff]  ;;  %v897_v58 = vld [vmem:[#allocation11 + $0x20] sm:$0xff] }
  0xa2   : > { %2003 = vmatprep.subr.mxu0 %v2683_v0  ;;  %2038 = vmatprep.subr.mxu1 %v2683_v0  ;;  %v896_v59 = vld [vmem:[#allocation11 + $0x18] sm:$0xff]  ;;  %v895_v60 = vld [vmem:[#allocation11 + $0x10] sm:$0xff]  ;;  %v894_v61 = vld [vmem:[#allocation11 + $0x8] sm:$0xff] }
  0xa3   : > { %2004 = vmatpush3.msra.mxu0 %v3009_v15  ;;  %2039 = vmatpush3.msra.mxu1 %v3011_v16  ;;  %v893_v62 = vld [vmem:[#allocation11] sm:$0xff]  ;;  %v1006_v63 = vld [vmem:[#allocation13 + $0x78] sm:$0xff] }
  0xa4   : > { %2005 = vmatprep.subr.mxu0 %v2683_v0  ;;  %2040 = vmatprep.subr.mxu1 %v2683_v0 }
  0xa5   : > { %2006 = vmatpush3.msra.mxu0 %v3017_v17  ;;  %2041 = vmatpush3.msra.mxu1 %v3019_v18 }
  0xa6   : > { %2007 = vmatprep.subr.mxu0 %v2683_v0  ;;  %2042 = vmatprep.subr.mxu1 %v2683_v0 }
  0xa7   : > { %2008 = vmatpush3.msra.mxu0 %v3025_v19  ;;  %2043 = vmatpush3.msra.mxu1 %v3027_v20 }
  0xa8   : > { %2009 = vmatprep.subr.mxu0 %v2683_v0  ;;  %2044 = vmatprep.subr.mxu1 %v2683_v0 }
  0xa9   : > { %2010 = vmatpush3.msra.mxu0 %v3033_v21  ;;  %2045 = vmatpush3.msra.mxu1 %v3035_v22 }
  0xaa   : > { %2011 = vmatprep.subr.mxu0 %v2683_v0  ;;  %2046 = vmatprep.subr.mxu1 %v2683_v0 }
  0xab   : > { %2012 = vmatpush3.msra.mxu0 %v3041_v23  ;;  %2047 = vmatpush3.msra.mxu1 %v3043_v24 }
  0xac   : > { %2013 = vmatprep.subr.mxu0 %v2683_v0  ;;  %2048 = vmatprep.subr.mxu1 %v2683_v0 }
  0xad   : > { %2014 = vmatpush3.msra.mxu0 %v3049_v25  ;;  %2049 = vmatpush3.msra.mxu1 %v3051_v26 }
  0xae   : > { %2015 = vmatprep.subr.mxu0 %v2683_v0  ;;  %2050 = vmatprep.subr.mxu1 %v2683_v0 }
  0xaf   : > { %2016 = vmatpush3.msra.mxu0 %v3057_v27  ;;  %2051 = vmatpush3.msra.mxu1 %v3059_v28 }
  0xb0   : > { %2017 = vmatprep.subr.mxu0 %v2683_v0  ;;  %2052 = vmatprep.subr.mxu1 %v2683_v0 }
  0xb1   : > { %2018 = vmatpush3.msra.mxu0 %v3065_v29  ;;  %2053 = vmatpush3.msra.mxu1 %v3067_v30 }
  0xb2   : > { %2019 = vmatprep.subr.mxu0 %v2683_v0  ;;  %2054 = vmatprep.subr.mxu1 %v2683_v0 }
  0xb3   : > { %2020 = vmatpush3.msra.mxu0 %v3073_v31  ;;  %2055 = vmatpush3.msra.mxu1 %v3075_v32 }
  0xb4   : > { %2022 = vmatmul.mubr.f32.vlgmr.msra.gmra.mxu0 %v573_v33  ;;  %2057 = vmatmul.mubr.f32.vlgmr.msra.gmra.mxu1 %v573_v33 }
  0xb5   : > { %2059 = vmatprep.subr.mxu0 %v2683_v0  ;;  %2064 = vmatprep.subr.mxu1 %v2683_v0 }
  0xb6   : > { %2061 = vmatprep.mubr.msk.f32.mxu0 %vm2684_vm0, %v2683_v0  ;;  %2066 = vmatprep.mubr.msk.f32.mxu1 %vm2684_vm0, %v2683_v0 }
 0x174   : > { %v640_v36 = vpop.f32.mrf.mxu0  ;;  %v710_v37 = vpop.f32.mrf.mxu1 }
 0x175   : > { %2060 = vmatpush3.msra.mxu0 %v640_v36  ;;  %2065 = vmatpush3.msra.mxu1 %v710_v37  ;;  %v1004_v36 = vld [vmem:[#allocation13 + $0x68] sm:$0xff]  ;;  %v1003_v37 = vld [vmem:[#allocation13 + $0x60] sm:$0xff] }
 0x176   : > { %v2023_v38 = vpop.f32.mrf.mxu0  ;;  %v2058_v39 = vpop.f32.mrf.mxu1  ;;  %2062 = vmatmul.mubr.msk.f32.vlgmr.msra.gmra.mxu0 %vm714_vm1, %v3090_v34  ;;  %2067 = vmatmul.mubr.msk.f32.vlgmr.msra.gmra.mxu1 %vm714_vm1, %v3092_v35 }
 0x177   : > { %2069 = vmatprep.subr.mxu0 %v2683_v0  ;;  %2101 = vmatprep.mubr.msk.f32.mxu0 %vm2684_vm0, %v2683_v0 }
 0x178   : > { %2104 = vmatprep.subr.mxu1 %v2683_v0  ;;  %2136 = vmatprep.mubr.msk.f32.mxu1 %vm2684_vm0, %v2683_v0 }
 0x179   : > { %2070 = vmatpush3.msra.mxu0 %v908_v47  ;;  %2105 = vmatpush3.msra.mxu1 %v1006_v63 }
 0x17a   : > { %2071 = vmatprep.subr.mxu0 %v2683_v0  ;;  %2106 = vmatprep.subr.mxu1 %v2683_v0 }
 0x17b   : > { %2072 = vmatpush3.msra.mxu0 %v907_v48 }
 0x17c   : > { %2073 = vmatprep.subr.mxu0 %v2683_v0 }
 0x17d   : > { %2074 = vmatpush3.msra.mxu0 %v906_v49  ;;  %v1821_v49 = vld [vmem:[%s3342_s5] ss:$0 sm:$0xff] }
 0x17e   : > { %2075 = vmatprep.subr.mxu0 %v2683_v0 }
 0x17f   : > { %2076 = vmatpush3.msra.mxu0 %v905_v50 }
 0x180   : > { %2077 = vmatprep.subr.mxu0 %v2683_v0 }
 0x181   : > { %2078 = vmatpush3.msra.mxu0 %v904_v51  ;;  %v1822_v51 = vld [vmem:[%s3343_s6] ss:$0 sm:$0xff] }
 0x182   : > { %2079 = vmatprep.subr.mxu0 %v2683_v0 }
 0x183   : > { %2080 = vmatpush3.msra.mxu0 %v903_v52 }
 0x184   : > { %2081 = vmatprep.subr.mxu0 %v2683_v0 }
 0x185   : > { %2082 = vmatpush3.msra.mxu0 %v902_v53 }
 0x186   : > { %2083 = vmatprep.subr.mxu0 %v2683_v0 }
 0x187   : > { %2084 = vmatpush3.msra.mxu0 %v901_v54 }
 0x188   : > { %2085 = vmatprep.subr.mxu0 %v2683_v0 }
 0x189   : > { %2086 = vmatpush3.msra.mxu0 %v900_v55 }
 0x18a   : > { %2087 = vmatprep.subr.mxu0 %v2683_v0 }
 0x18b   : > { %2088 = vmatpush3.msra.mxu0 %v899_v56 }
 0x18c   : > { %2089 = vmatprep.subr.mxu0 %v2683_v0 }
 0x18d   : > { %2090 = vmatpush3.msra.mxu0 %v898_v57 }
 0x18e   : > { %2091 = vmatprep.subr.mxu0 %v2683_v0 }
 0x18f   : > { %2092 = vmatpush3.msra.mxu0 %v897_v58  ;;  %v1825_v58 = vld [vmem:[%s3348_s11] ss:$0 sm:$0xff] }
 0x190   : > { %2093 = vmatprep.subr.mxu0 %v2683_v0 }
 0x191   : > { %2094 = vmatpush3.msra.mxu0 %v896_v59 }
 0x192   : > { %2095 = vmatprep.subr.mxu0 %v2683_v0 }
 0x193   : > { %2096 = vmatpush3.msra.mxu0 %v895_v60  ;;  %v1826_v60 = vld [vmem:[%s3349_s12] ss:$0 sm:$0xff] }
 0x194   : > { %2097 = vmatprep.subr.mxu0 %v2683_v0 }
 0x195   : > { %2098 = vmatpush3.msra.mxu0 %v894_v61 }
 0x196   : > { %2099 = vmatprep.subr.mxu0 %v2683_v0 }
 0x197   : > { %2100 = vmatpush3.msra.mxu0 %v893_v62 }
 0x198   : > { %2139 = vmatprep.subr.mxu0 %v2683_v0 }
 0x236   : > { %v784_v40 = vpop.f32.mrf.mxu0  ;;  %v857_v41 = vpop.f32.mrf.mxu1 }
 0x237   : > { %v861_v42 = vsub.f32 %v784_v40, %v857_v41 }
 0x238   : > { %v2063_v43 = vpop.f32.mrf.mxu0  ;;  %v2068_v44 = vpop.f32.mrf.mxu1 }
 0x239   : > { %v3104_v45 = vadd.f32 %v861_v42, %v573_v33  ;;  %v1005_v33 = vld [vmem:[#allocation13 + $0x70] sm:$0xff] }
 0x23a   : > { %2107 = vmatpush3.msra.mxu1 %v1005_v33 }
 0x23b   : > { %865 = vadd.xlane.f32.xlu0 %v3104_v45  ;;  %v868_v46 = vmul.f32 %v3104_v45, %v3104_v45  ;;  %2108 = vmatprep.subr.mxu1 %v2683_v0 }
 0x23c   : > { %2109 = vmatpush3.msra.mxu1 %v1004_v36 }
 0x23d   : > { %2110 = vmatprep.subr.mxu1 %v2683_v0 }
 0x23e   : > { %2111 = vmatpush3.msra.mxu1 %v1003_v37 }
 0x23f   : > { %869 = vadd.xlane.f32.xlu0 %v868_v46  ;;  %2112 = vmatprep.subr.mxu1 %v2683_v0 }
 0x2c4   : > { %v866_v38 = vpop.xlane.xlu0 %865 }
 0x2c5   : > { %v867_v39 = vmul.f32 0.03125, %v866_v38  ;;  %v1445_v38 = vld [vmem:[#allocation11 + $0xf8] sm:$0xff] }
 0x2c7   : > { %v872_v41 = vmul.f32 %v867_v39, %v867_v39  ;;  %v875_v47 = vsub.f32 %v3104_v45, %v867_v39 }
 0x2c8   : > { %v870_v40 = vpop.xlane.xlu0 %869 }
 0x2c9   : > { %v871_v42 = vmul.f32 0.03125, %v870_v40 }
 0x2cb   : > { %v873_v43 = vsub.f32 %v871_v42, %v872_v41 }
 0x2cd   : > { %v874_v44 = vmax.f32 %v873_v43, 0.0 }
 0x2cf   : > { %v876_v46 = vadd.f32 1e-12, %v874_v44  ;;  %v1444_v44 = vld [vmem:[#allocation11 + $0xf0] sm:$0xff] }
 0x2d1   : > { %2400 = vrsqrt.f32 %v876_v46  ;;  %v1443_v46 = vld [vmem:[#allocation11 + $0xe8] sm:$0xff] }
 0x2de   : > { %v2401_v48 = vpop.eup %2400 }
 0x2df   : > { %v878_v50 = vmul.f32 %v2401_v48, %v875_v47  ;;  %v1442_v47 = vld [vmem:[#allocation11 + $0xe0] sm:$0xff]  ;;  %v1441_v48 = vld [vmem:[#allocation11 + $0xd8] sm:$0xff] }
 0x2e1   : > { %v885_v52 = vmul.f32 %v1821_v49, %v878_v50  ;;  %v1440_v49 = vld [vmem:[#allocation11 + $0xd0] sm:$0xff]  ;;  %v1439_v50 = vld [vmem:[#allocation11 + $0xc8] sm:$0xff] }
 0x2e3   : > { %v3136_v53 = vadd.f32 %v1822_v51, %v885_v52  ;;  %v1438_v51 = vld [vmem:[#allocation11 + $0xc0] sm:$0xff]  ;;  %v1437_v52 = vld [vmem:[#allocation11 + $0xb8] sm:$0xff] }
 0x2e5   : > { %2102 = vmatmul.mubr.f32.vlgmr.msra.gmra.mxu0 %v3136_v53 }
 0x2e6   : > { %2140 = vmatpush3.msra.mxu0 %v2957_v1  ;;  %2171 = vmatprep.mubr.msk.f32.mxu0 %vm2684_vm0, %v2683_v0  ;;  %v1002_v1 = vld [vmem:[#allocation13 + $0x58] sm:$0xff] }
 0x2e7   : > { %2141 = vmatprep.subr.mxu0 %v2683_v0  ;;  %2113 = vmatpush3.msra.mxu1 %v1002_v1  ;;  %v1435_v1 = vld [vmem:[#allocation11 + $0xa8] sm:$0xff] }
 0x2e8   : > { %2142 = vmatpush3.msra.mxu0 %v2961_v3  ;;  %2114 = vmatprep.subr.mxu1 %v2683_v0  ;;  %v1001_v3 = vld [vmem:[#allocation13 + $0x50] sm:$0xff] }
 0x2e9   : > { %2143 = vmatprep.subr.mxu0 %v2683_v0  ;;  %2115 = vmatpush3.msra.mxu1 %v1001_v3  ;;  %v1434_v3 = vld [vmem:[#allocation11 + $0xa0] sm:$0xff] }
 0x2ea   : > { %2144 = vmatpush3.msra.mxu0 %v2969_v5  ;;  %2116 = vmatprep.subr.mxu1 %v2683_v0  ;;  %v1000_v5 = vld [vmem:[#allocation13 + $0x48] sm:$0xff] }
 0x2eb   : > { %2145 = vmatprep.subr.mxu0 %v2683_v0  ;;  %2117 = vmatpush3.msra.mxu1 %v1000_v5  ;;  %v1433_v5 = vld [vmem:[#allocation11 + $0x98] sm:$0xff] }
 0x2ec   : > { %2146 = vmatpush3.msra.mxu0 %v2977_v7  ;;  %2118 = vmatprep.subr.mxu1 %v2683_v0  ;;  %v999_v7 = vld [vmem:[#allocation13 + $0x40] sm:$0xff] }
 0x2ed   : > { %2147 = vmatprep.subr.mxu0 %v2683_v0  ;;  %2119 = vmatpush3.msra.mxu1 %v999_v7  ;;  %v1432_v7 = vld [vmem:[#allocation11 + $0x90] sm:$0xff] }
 0x2ee   : > { %2148 = vmatpush3.msra.mxu0 %v2985_v9  ;;  %2120 = vmatprep.subr.mxu1 %v2683_v0  ;;  %v998_v9 = vld [vmem:[#allocation13 + $0x38] sm:$0xff] }
 0x2ef   : > { %2149 = vmatprep.subr.mxu0 %v2683_v0  ;;  %2121 = vmatpush3.msra.mxu1 %v998_v9  ;;  %v1431_v9 = vld [vmem:[#allocation11 + $0x88] sm:$0xff] }
 0x2f0   : > { %2150 = vmatpush3.msra.mxu0 %v2993_v11  ;;  %2122 = vmatprep.subr.mxu1 %v2683_v0  ;;  %v997_v11 = vld [vmem:[#allocation13 + $0x30] sm:$0xff] }
 0x2f1   : > { %2151 = vmatprep.subr.mxu0 %v2683_v0  ;;  %2123 = vmatpush3.msra.mxu1 %v997_v11  ;;  %v1430_v11 = vld [vmem:[#allocation11 + $0x80] sm:$0xff] }
 0x2f2   : > { %2152 = vmatpush3.msra.mxu0 %v3001_v13  ;;  %2124 = vmatprep.subr.mxu1 %v2683_v0  ;;  %v996_v13 = vld [vmem:[#allocation13 + $0x28] sm:$0xff] }
 0x2f3   : > { %2153 = vmatprep.subr.mxu0 %v2683_v0  ;;  %2125 = vmatpush3.msra.mxu1 %v996_v13  ;;  %v1545_v13 = vld [vmem:[#allocation13 + $0xf8] sm:$0xff] }
 0x2f4   : > { %2154 = vmatpush3.msra.mxu0 %v3009_v15  ;;  %2126 = vmatprep.subr.mxu1 %v2683_v0  ;;  %v995_v15 = vld [vmem:[#allocation13 + $0x20] sm:$0xff] }
 0x2f5   : > { %2155 = vmatprep.subr.mxu0 %v2683_v0  ;;  %2127 = vmatpush3.msra.mxu1 %v995_v15  ;;  %v1544_v15 = vld [vmem:[#allocation13 + $0xf0] sm:$0xff] }
 0x2f6   : > { %2156 = vmatpush3.msra.mxu0 %v3017_v17  ;;  %2128 = vmatprep.subr.mxu1 %v2683_v0  ;;  %v994_v17 = vld [vmem:[#allocation13 + $0x18] sm:$0xff] }
 0x2f7   : > { %2157 = vmatprep.subr.mxu0 %v2683_v0  ;;  %2129 = vmatpush3.msra.mxu1 %v994_v17  ;;  %v1543_v17 = vld [vmem:[#allocation13 + $0xe8] sm:$0xff] }
 0x2f8   : > { %2158 = vmatpush3.msra.mxu0 %v3025_v19  ;;  %2130 = vmatprep.subr.mxu1 %v2683_v0  ;;  %v993_v19 = vld [vmem:[#allocation13 + $0x10] sm:$0xff] }
 0x2f9   : > { %2159 = vmatprep.subr.mxu0 %v2683_v0  ;;  %2131 = vmatpush3.msra.mxu1 %v993_v19  ;;  %v1542_v19 = vld [vmem:[#allocation13 + $0xe0] sm:$0xff] }
 0x2fa   : > { %2160 = vmatpush3.msra.mxu0 %v3033_v21  ;;  %2132 = vmatprep.subr.mxu1 %v2683_v0  ;;  %v992_v21 = vld [vmem:[#allocation13 + $0x8] sm:$0xff] }
 0x2fb   : > { %2161 = vmatprep.subr.mxu0 %v2683_v0  ;;  %2133 = vmatpush3.msra.mxu1 %v992_v21 }
 0x2fc   : > { %2162 = vmatpush3.msra.mxu0 %v3041_v23  ;;  %2134 = vmatprep.subr.mxu1 %v2683_v0  ;;  %v991_v23 = vld [vmem:[#allocation13] sm:$0xff] }
 0x2fd   : > { %2163 = vmatprep.subr.mxu0 %v2683_v0  ;;  %2135 = vmatpush3.msra.mxu1 %v991_v23 }
 0x2fe   : > { %2164 = vmatpush3.msra.mxu0 %v3049_v25  ;;  %2174 = vmatprep.subr.mxu1 %v2683_v0  ;;  %v1823_v25 = vld [vmem:[%s3345_s8] ss:$0 sm:$0xff] }
 0x2ff   : > { %2165 = vmatprep.subr.mxu0 %v2683_v0 }
 0x300   : > { %2166 = vmatpush3.msra.mxu0 %v3057_v27 }
 0x301   : > { %2167 = vmatprep.subr.mxu0 %v2683_v0 }
 0x302   : > { %2168 = vmatpush3.msra.mxu0 %v3065_v29 }
 0x303   : > { %2169 = vmatprep.subr.mxu0 %v2683_v0 }
 0x304   : > { %2170 = vmatpush3.msra.mxu0 %v3073_v31 }
 0x305   : > { %2209 = vmatprep.subr.mxu0 %v2683_v0 }
 0x3a5   : > { %v982_v27 = vpop.f32.mrf.mxu0 }
 0x3a6   : > { %v983_v29 = vadd.f32 %v1823_v25, %v982_v27 }
 0x3a7   : > { %v2103_v31 = vpop.f32.mrf.mxu0 }
 0x3a8   : > { %v987_v45 = vmul.f32 0.70710677, %v983_v29  ;;  %v986_v55 = vmul.f32 0.5, %v983_v29 }
 0x3aa   : > { %2402 = verf.f32 %v987_v45 }
 0x3b7   : > { %v2403_v54 = vpop.eup %2402 }
 0x3b8   : > { %v989_v56 = vadd.f32 1.0, %v2403_v54 }
 0x3ba   : > { %v990_v57 = vmul.f32 %v989_v56, %v986_v55 }
 0x3bc   : > { %2137 = vmatmul.mubr.f32.vlgmr.msra.gmra.mxu1 %v990_v57  ;;  %v1831_v57 = vld [vmem:[%s3342_s5 + $0x1] ss:$0 sm:$0xff] }
 0x3bd   : > { %2175 = vmatpush3.msra.mxu1 %v2959_v2  ;;  %2206 = vmatprep.mubr.msk.f32.mxu1 %vm2684_vm0, %v2683_v0  ;;  %v1824_v2 = vld [vmem:[%s3347_s10] ss:$0 sm:$0xff] }
 0x3be   : > { %2176 = vmatprep.subr.mxu1 %v2683_v0 }
 0x3bf   : > { %2177 = vmatpush3.msra.mxu1 %v2965_v4 }
 0x3c0   : > { %2178 = vmatprep.subr.mxu1 %v2683_v0 }
 0x3c1   : > { %2179 = vmatpush3.msra.mxu1 %v2971_v6 }
 0x3c2   : > { %2180 = vmatprep.subr.mxu1 %v2683_v0 }
 0x3c3   : > { %2181 = vmatpush3.msra.mxu1 %v2979_v8 }
 0x3c4   : > { %2182 = vmatprep.subr.mxu1 %v2683_v0 }
 0x3c5   : > { %2183 = vmatpush3.msra.mxu1 %v2987_v10 }
 0x3c6   : > { %2184 = vmatprep.subr.mxu1 %v2683_v0 }
 0x3c7   : > { %2185 = vmatpush3.msra.mxu1 %v2995_v12 }
 0x3c8   : > { %2186 = vmatprep.subr.mxu1 %v2683_v0 }
 0x3c9   : > { %2187 = vmatpush3.msra.mxu1 %v3003_v14 }
 0x3ca   : > { %2188 = vmatprep.subr.mxu1 %v2683_v0 }
 0x3cb   : > { %2189 = vmatpush3.msra.mxu1 %v3011_v16 }
 0x3cc   : > { %2190 = vmatprep.subr.mxu1 %v2683_v0 }
 0x3cd   : > { %2191 = vmatpush3.msra.mxu1 %v3019_v18 }
 0x3ce   : > { %2192 = vmatprep.subr.mxu1 %v2683_v0 }
 0x3cf   : > { %2193 = vmatpush3.msra.mxu1 %v3027_v20 }
 0x3d0   : > { %2194 = vmatprep.subr.mxu1 %v2683_v0 }
 0x3d1   : > { %2195 = vmatpush3.msra.mxu1 %v3035_v22 }
 0x3d2   : > { %2196 = vmatprep.subr.mxu1 %v2683_v0 }
 0x3d3   : > { %2197 = vmatpush3.msra.mxu1 %v3043_v24 }
 0x3d4   : > { %2198 = vmatprep.subr.mxu1 %v2683_v0 }
 0x3d5   : > { %2199 = vmatpush3.msra.mxu1 %v3051_v26 }
 0x3d6   : > { %2200 = vmatprep.subr.mxu1 %v2683_v0 }
 0x3d7   : > { %2201 = vmatpush3.msra.mxu1 %v3059_v28 }
 0x3d8   : > { %2202 = vmatprep.subr.mxu1 %v2683_v0 }
 0x3d9   : > { %2203 = vmatpush3.msra.mxu1 %v3067_v30 }
 0x3da   : > { %2204 = vmatprep.subr.mxu1 %v2683_v0 }
 0x3db   : > { %2205 = vmatpush3.msra.mxu1 %v3075_v32 }
 0x3dc   : > { %2214 = vmatprep.subr.mxu1 %v2683_v0 }
 0x47c   : > { %v1080_v4 = vpop.f32.mrf.mxu1 }
 0x47d   : > { %v1081_v6 = vadd.f32 %v1824_v2, %v1080_v4  ;;  %v1832_v4 = vld [vmem:[%s3343_s6 + $0x1] ss:$0 sm:$0xff] }
 0x47e   : > { %v2138_v8 = vpop.f32.mrf.mxu1 }
 0x47f   : > { %v1084_v10 = vadd.f32 %v1081_v6, %v3136_v53  ;;  %v1436_v53 = vld [vmem:[#allocation11 + $0xb0] sm:$0xff] }
 0x481   : > { %1087 = vadd.xlane.f32.xlu1 %v1084_v10  ;;  %v1090_v12 = vmul.f32 %v1084_v10, %v1084_v10 }
 0x485   : > { %1091 = vadd.xlane.f32.xlu1 %v1090_v12  ;;  %v1540_v12 = vld [vmem:[#allocation13 + $0xd0] sm:$0xff] }
 0x50a   : > { %v1088_v14 = vpop.xlane.xlu1 %1087 }
 0x50b   : > { %v1089_v16 = vmul.f32 0.03125, %v1088_v14  ;;  %v1539_v14 = vld [vmem:[#allocation13 + $0xc8] sm:$0xff] }
 0x50d   : > { %v1094_v20 = vmul.f32 %v1089_v16, %v1089_v16  ;;  %v1097_v30 = vsub.f32 %v1084_v10, %v1089_v16  ;;  %v1541_v10 = vld [vmem:[#allocation13 + $0xd8] sm:$0xff]  ;;  %v1538_v16 = vld [vmem:[#allocation13 + $0xc0] sm:$0xff] }
 0x50e   : > { %v1092_v18 = vpop.xlane.xlu1 %1091 }
 0x50f   : > { %v1093_v22 = vmul.f32 0.03125, %v1092_v18  ;;  %v1537_v18 = vld [vmem:[#allocation13 + $0xb8] sm:$0xff] }
 0x511   : > { %v1095_v24 = vsub.f32 %v1093_v22, %v1094_v20  ;;  %v1536_v20 = vld [vmem:[#allocation13 + $0xb0] sm:$0xff]  ;;  %v1535_v22 = vld [vmem:[#allocation13 + $0xa8] sm:$0xff] }
 0x513   : > { %v1096_v26 = vmax.f32 %v1095_v24, 0.0  ;;  %v1534_v24 = vld [vmem:[#allocation13 + $0xa0] sm:$0xff] }
 0x515   : > { %v1098_v28 = vadd.f32 1e-12, %v1096_v26  ;;  %v1533_v26 = vld [vmem:[#allocation13 + $0x98] sm:$0xff] }
 0x517   : > { %2404 = vrsqrt.f32 %v1098_v28  ;;  %v1532_v28 = vld [vmem:[#allocation13 + $0x90] sm:$0xff] }
 0x524   : > { %v2405_v32 = vpop.eup %2404 }
 0x525   : > { %v1100_v59 = vmul.f32 %v2405_v32, %v1097_v30  ;;  %v1531_v30 = vld [vmem:[#allocation13 + $0x88] sm:$0xff]  ;;  %v1530_v32 = vld [vmem:[#allocation13 + $0x80] sm:$0xff] }
 0x527   : > { %v1107_v61 = vmul.f32 %v1825_v58, %v1100_v59  ;;  %v1834_v58 = vld [vmem:[%s3345_s8 + $0x1] ss:$0 sm:$0xff] }
 0x529   : > { %v1114_v62 = vadd.f32 %v1826_v60, %v1107_v61 }
 0x52b   : > { %2172 = vmatmul.mubr.f32.vlgmr.msra.gmra.mxu0 %v1114_v62  ;;  %2207 = vmatmul.mubr.f32.vlgmr.msra.gmra.mxu1 %v1114_v62 }
 0x52c   : > { %2211 = vmatprep.mubr.msk.f32.mxu0 %vm2684_vm0, %v2683_v0  ;;  %2216 = vmatprep.mubr.msk.f32.mxu1 %vm2684_vm0, %v2683_v0 }
 0x5eb   : > { %v1181_v63 = vpop.f32.mrf.mxu0  ;;  %v1251_v33 = vpop.f32.mrf.mxu1 }
 0x5ec   : > { %2210 = vmatpush3.msra.mxu0 %v1181_v63  ;;  %2215 = vmatpush3.msra.mxu1 %v1251_v33 }
 0x5ed   : > { %v2173_v36 = vpop.f32.mrf.mxu0  ;;  %v2208_v37 = vpop.f32.mrf.mxu1  ;;  %2212 = vmatmul.mubr.msk.f32.vlgmr.msra.gmra.mxu0 %vm714_vm1, %v3090_v34  ;;  %2217 = vmatmul.mubr.msk.f32.vlgmr.msra.gmra.mxu1 %vm714_vm1, %v3092_v35 }
 0x5ee   : > { %2219 = vmatprep.subr.mxu0 %v2683_v0  ;;  %2251 = vmatprep.mubr.msk.f32.mxu0 %vm2684_vm0, %v2683_v0 }
 0x5ef   : > { %2254 = vmatprep.subr.mxu1 %v2683_v0  ;;  %2286 = vmatprep.mubr.msk.f32.mxu1 %vm2684_vm0, %v2683_v0 }
 0x5f0   : > { %2220 = vmatpush3.msra.mxu0 %v1445_v38  ;;  %2255 = vmatpush3.msra.mxu1 %v1545_v13 }
 0x5f1   : > { %2221 = vmatprep.subr.mxu0 %v2683_v0  ;;  %2256 = vmatprep.subr.mxu1 %v2683_v0 }
 0x5f2   : > { %2222 = vmatpush3.msra.mxu0 %v1444_v44  ;;  %2257 = vmatpush3.msra.mxu1 %v1544_v15 }
 0x5f3   : > { %2223 = vmatprep.subr.mxu0 %v2683_v0  ;;  %2258 = vmatprep.subr.mxu1 %v2683_v0 }
 0x5f4   : > { %2224 = vmatpush3.msra.mxu0 %v1443_v46  ;;  %2259 = vmatpush3.msra.mxu1 %v1543_v17 }
 0x5f5   : > { %2225 = vmatprep.subr.mxu0 %v2683_v0  ;;  %2260 = vmatprep.subr.mxu1 %v2683_v0 }
 0x5f6   : > { %2226 = vmatpush3.msra.mxu0 %v1442_v47  ;;  %2261 = vmatpush3.msra.mxu1 %v1542_v19 }
 0x5f7   : > { %2227 = vmatprep.subr.mxu0 %v2683_v0  ;;  %2262 = vmatprep.subr.mxu1 %v2683_v0 }
 0x5f8   : > { %2228 = vmatpush3.msra.mxu0 %v1441_v48  ;;  %2263 = vmatpush3.msra.mxu1 %v1541_v10 }
 0x5f9   : > { %2229 = vmatprep.subr.mxu0 %v2683_v0  ;;  %2264 = vmatprep.subr.mxu1 %v2683_v0 }
 0x5fa   : > { %2230 = vmatpush3.msra.mxu0 %v1440_v49  ;;  %2265 = vmatpush3.msra.mxu1 %v1540_v12 }
 0x5fb   : > { %2231 = vmatprep.subr.mxu0 %v2683_v0  ;;  %2266 = vmatprep.subr.mxu1 %v2683_v0 }
 0x5fc   : > { %2232 = vmatpush3.msra.mxu0 %v1439_v50  ;;  %2267 = vmatpush3.msra.mxu1 %v1539_v14 }
 0x5fd   : > { %2233 = vmatprep.subr.mxu0 %v2683_v0  ;;  %2268 = vmatprep.subr.mxu1 %v2683_v0 }
 0x5fe   : > { %2234 = vmatpush3.msra.mxu0 %v1438_v51  ;;  %2269 = vmatpush3.msra.mxu1 %v1538_v16 }
 0x5ff   : > { %2235 = vmatprep.subr.mxu0 %v2683_v0  ;;  %2270 = vmatprep.subr.mxu1 %v2683_v0 }
 0x600   : > { %2236 = vmatpush3.msra.mxu0 %v1437_v52  ;;  %2271 = vmatpush3.msra.mxu1 %v1537_v18  ;;  %v1839_v52 = vld [vmem:[%s3348_s11 + $0x1] ss:$0 sm:$0xff] }
 0x601   : > { %2237 = vmatprep.subr.mxu0 %v2683_v0  ;;  %2272 = vmatprep.subr.mxu1 %v2683_v0 }
 0x602   : > { %2238 = vmatpush3.msra.mxu0 %v1436_v53  ;;  %2273 = vmatpush3.msra.mxu1 %v1536_v20 }
 0x603   : > { %2239 = vmatprep.subr.mxu0 %v2683_v0  ;;  %2274 = vmatprep.subr.mxu1 %v2683_v0 }
 0x604   : > { %2240 = vmatpush3.msra.mxu0 %v1435_v1  ;;  %2275 = vmatpush3.msra.mxu1 %v1535_v22  ;;  %v1840_v1 = vld [vmem:[%s3349_s12 + $0x1] ss:$0 sm:$0xff] }
 0x605   : > { %2241 = vmatprep.subr.mxu0 %v2683_v0  ;;  %2276 = vmatprep.subr.mxu1 %v2683_v0 }
 0x606   : > { %2242 = vmatpush3.msra.mxu0 %v1434_v3  ;;  %2277 = vmatpush3.msra.mxu1 %v1534_v24 }
 0x607   : > { %2243 = vmatprep.subr.mxu0 %v2683_v0  ;;  %2278 = vmatprep.subr.mxu1 %v2683_v0 }
 0x608   : > { %2244 = vmatpush3.msra.mxu0 %v1433_v5  ;;  %2279 = vmatpush3.msra.mxu1 %v1533_v26 }
 0x609   : > { %2245 = vmatprep.subr.mxu0 %v2683_v0  ;;  %2280 = vmatprep.subr.mxu1 %v2683_v0 }
 0x60a   : > { %2246 = vmatpush3.msra.mxu0 %v1432_v7  ;;  %2281 = vmatpush3.msra.mxu1 %v1532_v28 }
 0x60b   : > { %2247 = vmatprep.subr.mxu0 %v2683_v0  ;;  %2282 = vmatprep.subr.mxu1 %v2683_v0 }
 0x60c   : > { %2248 = vmatpush3.msra.mxu0 %v1431_v9  ;;  %2283 = vmatpush3.msra.mxu1 %v1531_v30 }
 0x60d   : > { %2249 = vmatprep.subr.mxu0 %v2683_v0  ;;  %2284 = vmatprep.subr.mxu1 %v2683_v0  ;;  %v1836_v0 = vld [vmem:[%s3347_s10 + $0x1] ss:$0 sm:$0xff] }
 0x60e   : > { %2250 = vmatpush3.msra.mxu0 %v1430_v11  ;;  %2285 = vmatpush3.msra.mxu1 %v1530_v32 }
 0x6ad   : > { %v1321_v39 = vpop.f32.mrf.mxu0  ;;  %v1391_v40 = vpop.f32.mrf.mxu1 }
 0x6ae   : > { %v1395_v34 = vsub.f32 %v1321_v39, %v1391_v40 }
 0x6af   : > { %v2213_v41 = vpop.f32.mrf.mxu0  ;;  %v2218_v42 = vpop.f32.mrf.mxu1 }
 0x6b0   : > { %v3247_v35 = vadd.f32 %v1395_v34, %v1114_v62 }
 0x6b2   : > { %1401 = vadd.xlane.f32.xlu0 %v3247_v35  ;;  %v1404_v43 = vmul.f32 %v3247_v35, %v3247_v35 }
 0x6b4   : > { %1405 = vadd.xlane.f32.xlu1 %v1404_v43 }
 0x73b   : > { %v1402_v21 = vpop.xlane.xlu0 %1401 }
 0x73c   : > { %v1403_v23 = vmul.f32 0.03125, %v1402_v21 }
 0x73d   : > { %v1406_v25 = vpop.xlane.xlu1 %1405 }
 0x73e   : > { %v1408_v27 = vmul.f32 %v1403_v23, %v1403_v23  ;;  %v1407_v29 = vmul.f32 0.03125, %v1406_v25  ;;  %v1411_v55 = vsub.f32 %v3247_v35, %v1403_v23 }
 0x740   : > { %v1409_v31 = vsub.f32 %v1407_v29, %v1408_v27 }
 0x742   : > { %v1410_v45 = vmax.f32 %v1409_v31, 0.0 }
 0x744   : > { %v1412_v54 = vadd.f32 1e-12, %v1410_v45 }
 0x746   : > { %2406 = vrsqrt.f32 %v1412_v54 }
 0x753   : > { %v2407_v56 = vpop.eup %2406 }
 0x754   : > { %v1414_v2 = vmul.f32 %v2407_v56, %v1411_v55 }
 0x756   : > { %v1421_v6 = vmul.f32 %v1831_v57, %v1414_v2 }
 0x758   : > { %v1428_v8 = vadd.f32 %v1832_v4, %v1421_v6 }
 0x75a   : > { %2252 = vmatmul.mubr.f32.vlgmr.msra.gmra.mxu0 %v1428_v8 }
 0x81a   : > { %v1520_v59 = vpop.f32.mrf.mxu0 }
 0x81b   : > { %v1521_v60 = vadd.f32 %v1834_v58, %v1520_v59 }
 0x81c   : > { %v2253_v61 = vpop.f32.mrf.mxu0 }
 0x81d   : > { %v1525_v62 = vmul.f32 0.70710677, %v1521_v60  ;;  %v1524_v33 = vmul.f32 0.5, %v1521_v60 }
 0x81f   : > { %2408 = verf.f32 %v1525_v62 }
 0x82c   : > { %v2409_v63 = vpop.eup %2408 }
 0x82d   : > { %v1527_v36 = vadd.f32 1.0, %v2409_v63 }
 0x82f   : > { %v1528_v37 = vmul.f32 %v1527_v36, %v1524_v33 }
 0x831   : > { %2287 = vmatmul.mubr.f32.vlgmr.msra.gmra.mxu1 %v1528_v37 }
 0x8f1   : > { %v1620_v38 = vpop.f32.mrf.mxu1 }
 0x8f2   : > { %v1621_v39 = vadd.f32 %v1836_v0, %v1620_v38 }
 0x8f3   : > { %v2288_v40 = vpop.f32.mrf.mxu1 }
 0x8f4   : > { %v1624_v34 = vadd.f32 %v1621_v39, %v1428_v8 }
 0x8f6   : > { %1629 = vadd.xlane.f32.xlu0 %v1624_v34  ;;  %v1632_v41 = vmul.f32 %v1624_v34, %v1624_v34 }
 0x8f8   : > { %1633 = vadd.xlane.f32.xlu1 %v1632_v41 }
 0x97f   : > { %v1630_v42 = vpop.xlane.xlu0 %1629 }
 0x980   : > { %v1631_v35 = vmul.f32 0.03125, %v1630_v42 }
 0x981   : > { %v1634_v43 = vpop.xlane.xlu1 %1633 }
 0x982   : > { %v1636_v44 = vmul.f32 %v1631_v35, %v1631_v35  ;;  %v1635_v46 = vmul.f32 0.03125, %v1634_v43  ;;  %v1639_v50 = vsub.f32 %v1624_v34, %v1631_v35 }
 0x984   : > { %v1637_v47 = vsub.f32 %v1635_v46, %v1636_v44 }
 0x986   : > { %v1638_v48 = vmax.f32 %v1637_v47, 0.0 }
 0x988   : > { %v1640_v49 = vadd.f32 1e-12, %v1638_v48 }
 0x98a   : > { %2410 = vrsqrt.f32 %v1640_v49 }
 0x997   : > { %v2411_v51 = vpop.eup %2410 }
 0x998   : > { %v1642_v53 = vmul.f32 %v2411_v51, %v1639_v50 }
 0x99a   : > { %v1649_v3 = vmul.f32 %v1839_v52, %v1642_v53 }
 0x99c   : > { %v1656_v5 = vadd.f32 %v1840_v1, %v1649_v3 }
 0x99e   : > { %1657 = vst [vmem:[%s538_s24] sm:$0xff] %v1656_v5 }
 0x99f   : > { %2609 = shalt.err (!%p2606_p1)
}
 0x9a0   : > { %s2610_s22 = scalar_lea.hbm %s1670_s3, 128  ;;  %s2614_s13 = scalar_lea.hbm %s3386_s2, 256 }
 0x9a1   : > { %p2611_p3 = scmp.ne.s32.totalorder %s1670_s3, %s2610_s22  ;;  %p2615_p12 = scmp.lt.s32.totalorder %s1670_s3, %s3386_s2 }
 0x9a2   : > { %p2616_p11 = scmp.lt.s32.totalorder %s2614_s13, %s2610_s22 }
 0x9a3   : > { %p2612_p6 = pnand %p2611_p3, %p3387_p2 }
 0x9a4   : > { %p2617_p7 = por %p2616_p11, %p2615_p12 }
 0x9a5   : > { %p2613_p10 = pneg %p2612_p6 }
 0x9a7   : > { %p2618_p5 = pnand %p2617_p7, %p2613_p10 }
 0x9a9   : > { %2621 = shalt.err (!%p2618_p5)
}
 0x9aa   : > { %2315 = dma.vmem_to_hbm [thread:$0]  (%p3387_p2), %s1673_s9, 128, %s1670_s3, %s1659_s4  }
 0x9ab PF: > { %s1684_s24 = sand.u32 1, %s2660_s25   ;;  %p3388_p9 = scmp.ne.s32.totalorder %s3376_s20, 0 }
 0x9ac   : > { %p3389_p8 = scmp.ge.s32.totalorder %s2672_s28, 2  ;;  %s1685_s19 = scalar_lea.sflag [#allocation4], %s1684_s24 }
 0x9ae   : > { %p2341_p4 = pnand %p3389_p8, %p3388_p9 }
 0x9b0   : > { %p2342_p0 = pneg %p2341_p4 }
 0x9b2   : > { %2655 = dma.done.wait (%p2342_p0), %s1685_s19, 128  }
 0x9b3   : > { %2657 = vsyncadd (%p2342_p0), %s1685_s19, 4294967168  ;;  %s3390_s1 = sld [smem:[#allocation20_spill]]  ;;  %p29_p13 = scmp.ge.s32.totalorder %s2864_s21, 4  }
 0x9b4   : > { %s3391_s25 = smov %s2664_s26  ;;  %s3392_s26 = smov %s2668_s27 }
 0x9b5   : > { %s3394_s28 = smov %s2864_s21  ;;  %31 = sbr.rel (!%p29_p13) target bundleno = 16 (0x10), region = 149 }
 0x9b9   : > { %s3393_s27 = smov %s3390_s1 }
 0x9ba   :  { %1690 = vsyncpa [#allocation3], 1 }
 0x9bb   :  { %1692 = vsyncpa [#allocation3 + $0x1], 1 }
 0x9bc   :  { %1693 = vsyncpa [#allocation6], 1 }
 0x9bd   :  { %1694 = vsyncpa [#allocation9], 1 }
 0x9be   :  { %1695 = vsyncpa [#allocation12], 1 }
 0x9bf   :  { %1696 = vsyncpa [#allocation4], 1 }
 0x9c0   :  { %1698 = vsyncpa [#allocation4 + $0x1], 1 }

</bundles_post_ra>
